<compile_context>
chip_gen: v6e
topology: v6e:2x2x1
jax: 0.10.0
libtpu: 0.0.40
codegen_flags: <defaults>
</compile_context>

<pallas_src>
import jax
import jax.numpy as jnp
import numpy as np
from jax.experimental import pallas as pl
from jax.experimental.pallas import tpu as pltpu

LATENT = 8      # latent_dims
D_IN = 1600     # 1*40*40
D_HID = 512


# ------------------------------ Pallas kernel --------------------------------

def encoder_kernel(x_ref, noise_ref, w1q_ref, w1s_ref, b1_ref, w23_ref, b23_ref,
                   z_ref, kl_ref):
    # x:(tm,1600) f32        w1q:(1600,512) int8   w1s,b1:(1,512) f32
    # w23:(512,2L) bf16 (== [W2 | W3])             b23:(1,2L) f32
    # noise:(tm,L) f32  ->   z:(tm,L) f32, kl:(1,1) f32 (accumulated over grid)

    @pl.when(pl.program_id(0) == 0)
    def _init():
        kl_ref[...] = jnp.zeros_like(kl_ref)

    # ---- layer 1: int8-weight GEMM on the bf16 MXU path, VPU dequant after --
    x_bf16 = x_ref[...].astype(jnp.bfloat16)
    w1_bf16 = w1q_ref[...].astype(jnp.bfloat16)          # exact: |q| <= 127
    h = jnp.dot(x_bf16, w1_bf16, preferred_element_type=jnp.float32)
    h = h * w1s_ref[...] + b1_ref[...]                   # per-column dequant + bias
    h = jnp.maximum(h, 0.0)                              # relu

    # ---- fused mu | log_sigma projection (single bf16 MXU push) -------------
    y = jnp.dot(h.astype(jnp.bfloat16), w23_ref[...],
                preferred_element_type=jnp.float32) + b23_ref[...]
    mu = y[:, :LATENT]
    log_sigma = y[:, LATENT:]
    sigma = jnp.exp(log_sigma)

    z_ref[...] = mu + sigma * noise_ref[...]
    kl_ref[...] += jnp.sum(sigma * sigma + mu * mu - log_sigma - 0.5,
                           axis=(0, 1), keepdims=True)


# --------------------------------- wrapper ------------------------------------

def pallas_forward(x, p, noise, *, batch_tile=None, vmem_limit_bytes=None):
    """Forward of VariationalEncoder.  Returns (z, kl) with kl a scalar."""
    B = x.shape[0]
    xf = x.reshape(B, -1).astype(jnp.float32)            # flatten(start_dim=1)

    # Batch tile: single invocation for small B; tile (multiple of 8) if large
    # (e.g. to stay inside v7x's 64 MiB VMEM) while W1 stays resident.
    tm = B if (batch_tile is None or batch_tile >= B) else batch_tile
    assert B % tm == 0 and (tm == B or tm % 8 == 0), (B, tm)
    grid = (B // tm,)

    L2 = 2 * LATENT
    cost = pl.CostEstimate(
        flops=2 * B * D_IN * D_HID + 2 * B * D_HID * L2,
        transcendentals=B * LATENT,
        bytes_accessed=(D_IN * D_HID * 1          # w1 int8
                        + D_HID * 4 * 2           # scale + b1
                        + D_HID * L2 * 2          # w23 bf16
                        + L2 * 4                  # b23
                        + B * D_IN * 4            # x
                        + B * LATENT * 4 * 2      # noise + z
                        + 4),                     # kl
    )

    cp_kwargs = dict(dimension_semantics=("arbitrary",))   # kl carried across tiles
    if vmem_limit_bytes is not None:
        cp_kwargs["vmem_limit_bytes"] = vmem_limit_bytes

    z, kl = pl.pallas_call(
        encoder_kernel,
        out_shape=(jax.ShapeDtypeStruct((B, LATENT), jnp.float32),
                   jax.ShapeDtypeStruct((1, 1), jnp.float32)),
        grid_spec=pltpu.PrefetchScalarGridSpec(
            num_scalar_prefetch=0,
            grid=grid,
            in_specs=[
                pl.BlockSpec((tm, D_IN), lambda i: (i, 0)),       # x      (streamed)
                pl.BlockSpec((tm, LATENT), lambda i: (i, 0)),     # noise  (streamed)
                pl.BlockSpec((D_IN, D_HID), lambda i: (0, 0)),    # w1 q   (resident)
                pl.BlockSpec((1, D_HID), lambda i: (0, 0)),       # w1 scale
                pl.BlockSpec((1, D_HID), lambda i: (0, 0)),       # b1
                pl.BlockSpec((D_HID, L2), lambda i: (0, 0)),      # w23
                pl.BlockSpec((1, L2), lambda i: (0, 0)),          # b23
            ],
            out_specs=(
                pl.BlockSpec((tm, LATENT), lambda i: (i, 0)),     # z
                pl.BlockSpec((1, 1), lambda i: (0, 0)),           # kl accumulator
            ),
        ),
        compiler_params=pltpu.CompilerParams(**cp_kwargs),
        cost_estimate=cost,
    )(xf, noise, p['w1_q'], p['w1_scale'], p['b1_r'], p['w23'], p['b23_r'])

    return z, kl[0, 0]


# ----------------------------- pure-JAX reference -----------------------------

def reference_forward(x, p, noise):
    """f32 evaluation of the module given the SAME stored (quantized) weights."""
    B = x.shape[0]
    xf = x.reshape(B, -1).astype(jnp.float32)
    w1 = p['w1_q'].astype(jnp.float32) * p['w1_scale']        # dequantized W1
    h = jax.nn.relu(xf @ w1 + p['b1_r'])
    w23 = p['w23'].astype(jnp.float32)
    y = h @ w23 + p['b23_r']
    mu, log_sigma = y[:, :LATENT], y[:, LATENT:]
    sigma = jnp.exp(log_sigma)
    z = mu + sigma * noise
    kl = jnp.sum(sigma ** 2 + mu ** 2 - log_sigma - 0.5)
    return z, kl


# ---------------------------------- params ------------------------------------

def init_params(key):
    def unif(k, shape, fan_in):
        bound = 1.0 / np.sqrt(fan_in)
        return jax.random.uniform(k, shape, jnp.float32, -bound, bound)

    ks = jax.random.split(key, 6)
    w1 = unif(ks[0], (D_IN, D_HID), D_IN)          # stored (in, out)
    b1 = unif(ks[1], (D_HID,), D_IN)
    w2 = unif(ks[2], (D_HID, LATENT), D_HID)
    b2 = unif(ks[3], (LATENT,), D_HID)
    w3 = unif(ks[4], (D_HID, LATENT), D_HID)
    b3 = unif(ks[5], (LATENT,), D_HID)

    # int8 symmetric per-output-column quantization of W1 (deliberate training
    # precision choice: halves the dominant HBM stream on v5e/v6e/v7x).
    absmax = jnp.max(jnp.abs(w1), axis=0, keepdims=True)            # (1,512)
    scale = jnp.maximum(absmax / 127.0, 1e-12)
    w1_q = jnp.clip(jnp.round(w1 / scale), -127, 127).astype(jnp.int8)

    return {
        'w1_q': w1_q,                                               # (1600,512) int8
        'w1_scale': scale.astype(jnp.float32),                      # (1,512)   f32
        'b1_r': b1[None, :],                                        # (1,512)   f32
        'w23': jnp.concatenate([w2, w3], axis=1).astype(jnp.bfloat16),  # (512,2L) bf16
        'b23_r': jnp.concatenate([b2, b3])[None, :],                # (1,2L)    f32
    }


# ----------------------------------- main --------------------------------------

if __name__ == "__main__":
    key = jax.random.PRNGKey(0)
    kp, kx, kn = jax.random.split(key, 3)
    params = init_params(kp)
    x = jax.random.normal(kx, (2, 1, 40, 40), jnp.float32)   # flattens to (2, 1600)
    noise = jax.random.normal(kn, (2, LATENT), jnp.float32)  # reparameterization eps

    z, kl = pallas_forward(x, params, noise)
    z, kl = jax.block_until_ready((z, kl))

    assert z.shape == (2, LATENT), z.shape
    assert kl.shape == (), kl.shape
    assert bool(jnp.all(jnp.isfinite(z)))
    assert bool(jnp.isfinite(kl))

    z_ref, kl_ref = reference_forward(x, params, noise)
    err_z = float(jnp.max(jnp.abs(z - z_ref)))
    err_kl = float(jnp.abs(kl - kl_ref)) / (1.0 + float(jnp.abs(kl_ref)))
    assert err_z < 5e-2, f"z max abs diff vs reference = {err_z}"
    assert err_kl < 5e-2, f"kl relative diff vs reference = {err_kl}"

    print("KERNEL_OK")
</pallas_src>

<mosaic_0001>
module attributes {stable_mosaic.version = 11 : i64} {
  func.func @encoder_kernel(%arg0: i32, %arg1: memref<2x1600xf32, #tpu.memory_space<vmem>>, %arg2: memref<2x8xf32, #tpu.memory_space<vmem>>, %arg3: memref<1600x512xi8, #tpu.memory_space<vmem>>, %arg4: memref<1x512xf32, #tpu.memory_space<vmem>>, %arg5: memref<1x512xf32, #tpu.memory_space<vmem>>, %arg6: memref<512x16xbf16, #tpu.memory_space<vmem>>, %arg7: memref<1x16xf32, #tpu.memory_space<vmem>>, %arg8: memref<2x8xf32, #tpu.memory_space<vmem>>, %arg9: memref<1x1xf32, #tpu.memory_space<vmem>>) attributes {dimension_semantics = [#tpu.dimension_semantics<arbitrary>], iteration_bounds = array<i64: 1>, scalar_prefetch = 0 : i64, scratch_operands = 0 : i64, tpu.core_type = #tpu.core_type<tc>, window_params = [{transform_indices = @transform_0, window_bounds = array<i64: 2, 1600>}, {transform_indices = @transform_1, window_bounds = array<i64: 2, 8>}, {pipeline_mode = #tpu.pipeline_mode<synchronous>, transform_indices = @transform_2, window_bounds = array<i64: 1600, 512>}, {pipeline_mode = #tpu.pipeline_mode<synchronous>, transform_indices = @transform_3, window_bounds = array<i64: 1, 512>}, {pipeline_mode = #tpu.pipeline_mode<synchronous>, transform_indices = @transform_4, window_bounds = array<i64: 1, 512>}, {pipeline_mode = #tpu.pipeline_mode<synchronous>, transform_indices = @transform_5, window_bounds = array<i64: 512, 16>}, {pipeline_mode = #tpu.pipeline_mode<synchronous>, transform_indices = @transform_6, window_bounds = array<i64: 1, 16>}, {transform_indices = @transform_7, window_bounds = array<i64: 2, 8>}, {pipeline_mode = #tpu.pipeline_mode<synchronous>, transform_indices = @transform_8, window_bounds = array<i64: 1, 1>}]} {
    %c0_i32 = arith.constant 0 : i32
    %0 = arith.cmpi eq, %arg0, %c0_i32 : i32
    %1 = arith.extui %0 : i1 to i32
    %c0_i32_0 = arith.constant 0 : i32
    %2 = arith.cmpi ne, %1, %c0_i32_0 : i32
    scf.if %2 {
      %cst_24 = arith.constant 0.000000e+00 : f32
      %43 = vector.broadcast %cst_24 : f32 to vector<1x1xf32>
      %c0_25 = arith.constant 0 : index
      %c0_26 = arith.constant 0 : index
      %44 = vector.load %arg9[%c0_25, %c0_26] : memref<1x1xf32, #tpu.memory_space<vmem>>, vector<1x1xf32>
      tpu.vector_store %arg9[%c0_25, %c0_26], %43 {strides = array<i32>} : memref<1x1xf32, #tpu.memory_space<vmem>>, vector<1x1xf32>,
    } else {
    }
    %c0 = arith.constant 0 : index
    %c0_1 = arith.constant 0 : index
    %3 = vector.load %arg1[%c0, %c0_1] : memref<2x1600xf32, #tpu.memory_space<vmem>>, vector<2x1600xf32>
    %4 = arith.truncf %3 : vector<2x1600xf32> to vector<2x1600xbf16>
    %c0_2 = arith.constant 0 : index
    %c0_3 = arith.constant 0 : index
    %5 = vector.load %arg3[%c0_2, %c0_3] : memref<1600x512xi8, #tpu.memory_space<vmem>>, vector<1600x512xi8>
    %6 = arith.sitofp %5 : vector<1600x512xi8> to vector<1600x512xbf16>
    %cst = arith.constant dense<0.000000e+00> : vector<2x512xf32>
    %7 = tpu.matmul %4, %6, %cst {dimension_numbers = #tpu.dot_dimension_numbers<[1], [0], [0], [1], [0, 0, 1, 1], [], []>} : vector<2x1600xbf16>, vector<1600x512xbf16>, vector<2x512xf32> -> vector<2x512xf32>
    %c0_4 = arith.constant 0 : index
    %c0_5 = arith.constant 0 : index
    %8 = vector.load %arg4[%c0_4, %c0_5] : memref<1x512xf32, #tpu.memory_space<vmem>>, vector<1x512xf32>
    %9 = vector.broadcast %8 : vector<1x512xf32> to vector<2x512xf32>
    %10 = arith.mulf %7, %9 : vector<2x512xf32>
    %c0_6 = arith.constant 0 : index
    %c0_7 = arith.constant 0 : index
    %11 = vector.load %arg5[%c0_6, %c0_7] : memref<1x512xf32, #tpu.memory_space<vmem>>, vector<1x512xf32>
    %12 = vector.broadcast %11 : vector<1x512xf32> to vector<2x512xf32>
    %13 = arith.addf %10, %12 : vector<2x512xf32>
    %cst_8 = arith.constant 0.000000e+00 : f32
    %14 = vector.broadcast %cst_8 : f32 to vector<2x512xf32>
    %15 = arith.maximumf %13, %14 : vector<2x512xf32>
    %16 = arith.truncf %15 : vector<2x512xf32> to vector<2x512xbf16>
    %c0_9 = arith.constant 0 : index
    %c0_10 = arith.constant 0 : index
    %17 = vector.load %arg6[%c0_9, %c0_10] : memref<512x16xbf16, #tpu.memory_space<vmem>>, vector<512x16xbf16>
    %cst_11 = arith.constant dense<0.000000e+00> : vector<2x16xf32>
    %18 = tpu.matmul %16, %17, %cst_11 {dimension_numbers = #tpu.dot_dimension_numbers<[1], [0], [0], [1], [0, 0, 1, 1], [], []>} : vector<2x512xbf16>, vector<512x16xbf16>, vector<2x16xf32> -> vector<2x16xf32>
    %c0_12 = arith.constant 0 : index
    %c0_13 = arith.constant 0 : index
    %19 = vector.load %arg7[%c0_12, %c0_13] : memref<1x16xf32, #tpu.memory_space<vmem>>, vector<1x16xf32>
    %20 = vector.broadcast %19 : vector<1x16xf32> to vector<2x16xf32>
    %21 = arith.addf %18, %20 : vector<2x16xf32>
    %22 = vector.extract_strided_slice %21 {offsets = [0, 0], sizes = [2, 8], strides = [1, 1]} : vector<2x16xf32> to vector<2x8xf32>
    %23 = vector.extract_strided_slice %21 {offsets = [0, 8], sizes = [2, 8], strides = [1, 1]} : vector<2x16xf32> to vector<2x8xf32>
    %24 = math.exp %23 : vector<2x8xf32>
    %c0_14 = arith.constant 0 : index
    %c0_15 = arith.constant 0 : index
    %25 = vector.load %arg2[%c0_14, %c0_15] : memref<2x8xf32, #tpu.memory_space<vmem>>, vector<2x8xf32>
    %26 = arith.mulf %24, %25 : vector<2x8xf32>
    %27 = arith.addf %22, %26 : vector<2x8xf32>
    %c0_16 = arith.constant 0 : index
    %c0_17 = arith.constant 0 : index
    %28 = vector.load %arg8[%c0_16, %c0_17] : memref<2x8xf32, #tpu.memory_space<vmem>>, vector<2x8xf32>
    tpu.vector_store %arg8[%c0_16, %c0_17], %27 {strides = array<i32>} : memref<2x8xf32, #tpu.memory_space<vmem>>, vector<2x8xf32>,
    %c0_18 = arith.constant 0 : index
    %c0_19 = arith.constant 0 : index
    %29 = vector.load %arg9[%c0_18, %c0_19] : memref<1x1xf32, #tpu.memory_space<vmem>>, vector<1x1xf32>
    %30 = arith.mulf %24, %24 : vector<2x8xf32>
    %31 = arith.mulf %22, %22 : vector<2x8xf32>
    %32 = arith.addf %30, %31 : vector<2x8xf32>
    %33 = arith.subf %32, %23 : vector<2x8xf32>
    %cst_20 = arith.constant 5.000000e-01 : f32
    %34 = vector.broadcast %cst_20 : f32 to vector<2x8xf32>
    %35 = arith.subf %33, %34 : vector<2x8xf32>
    %36 = vector.shape_cast %35 : vector<2x8xf32> to vector<1x2x8xf32>
    %cst_21 = arith.constant dense<0.000000e+00> : vector<1xf32>
    %37 = vector.multi_reduction <add>, %36, %cst_21 [1, 2] : vector<1x2x8xf32> to vector<1xf32>
    %38 = vector.shape_cast %37 : vector<1xf32> to vector<1x1x1xf32>
    %39 = vector.extract %38[0, 0, 0] : f32 from vector<1x1x1xf32>
    %40 = vector.broadcast %39 : f32 to vector<1x1xf32>
    %41 = arith.addf %29, %40 : vector<1x1xf32>
    %c0_22 = arith.constant 0 : index
    %c0_23 = arith.constant 0 : index
    %42 = vector.load %arg9[%c0_22, %c0_23] : memref<1x1xf32, #tpu.memory_space<vmem>>, vector<1x1xf32>
    tpu.vector_store %arg9[%c0_22, %c0_23], %41 {strides = array<i32>} : memref<1x1xf32, #tpu.memory_space<vmem>>, vector<1x1xf32>,
    return
  }
  func.func @transform_0(%arg0: i32) -> (i32, i32) {
    %c0_i32 = arith.constant 0 : i32
    %c0_i32_0 = arith.constant 0 : i32
    return %arg0, %c0_i32 : i32, i32
  }
  func.func @transform_1(%arg0: i32) -> (i32, i32) {
    %c0_i32 = arith.constant 0 : i32
    %c0_i32_0 = arith.constant 0 : i32
    return %arg0, %c0_i32 : i32, i32
  }
  func.func @transform_2(%arg0: i32) -> (i32, i32) {
    %c0_i32 = arith.constant 0 : i32
    %c0_i32_0 = arith.constant 0 : i32
    %c0_i32_1 = arith.constant 0 : i32
    return %c0_i32, %c0_i32_0 : i32, i32
  }
  func.func @transform_3(%arg0: i32) -> (i32, i32) {
    %c0_i32 = arith.constant 0 : i32
    %c0_i32_0 = arith.constant 0 : i32
    %c0_i32_1 = arith.constant 0 : i32
    return %c0_i32, %c0_i32_0 : i32, i32
  }
  func.func @transform_4(%arg0: i32) -> (i32, i32) {
    %c0_i32 = arith.constant 0 : i32
    %c0_i32_0 = arith.constant 0 : i32
    %c0_i32_1 = arith.constant 0 : i32
    return %c0_i32, %c0_i32_0 : i32, i32
  }
  func.func @transform_5(%arg0: i32) -> (i32, i32) {
    %c0_i32 = arith.constant 0 : i32
    %c0_i32_0 = arith.constant 0 : i32
    %c0_i32_1 = arith.constant 0 : i32
    return %c0_i32, %c0_i32_0 : i32, i32
  }
  func.func @transform_6(%arg0: i32) -> (i32, i32) {
    %c0_i32 = arith.constant 0 : i32
    %c0_i32_0 = arith.constant 0 : i32
    %c0_i32_1 = arith.constant 0 : i32
    return %c0_i32, %c0_i32_0 : i32, i32
  }
  func.func @transform_7(%arg0: i32) -> (i32, i32) {
    %c0_i32 = arith.constant 0 : i32
    %c0_i32_0 = arith.constant 0 : i32
    return %arg0, %c0_i32 : i32, i32
  }
  func.func @transform_8(%arg0: i32) -> (i32, i32) {
    %c0_i32 = arith.constant 0 : i32
    %c0_i32_0 = arith.constant 0 : i32
    %c0_i32_1 = arith.constant 0 : i32
    return %c0_i32, %c0_i32_0 : i32, i32
  }
}

</mosaic_0001>

<bundles_post_ra>
// kernel: tpu_custom_call.1
= control target key start
LH: loop header
LB: loop body
LE: loop exit
PB: predicated region body
PF: predicated region fallthrough
CT: control target
= control target key end

     0   :  { %14 = vsyncpa [#allocation3], 0  ;;  %s2317_s0 = inlined_call_operand.vmem [shape: f32[2,1600], index: 0, kind: input, shape index: {}]   ;;  %s2318_s1 = inlined_call_operand.vmem [shape: f32[2,8], index: 1, kind: input, shape index: {}]   ;;  %s2319_s2 = inlined_call_operand.hbm [shape: s8[1600,512], index: 2, kind: input, shape index: {}]   ;;  %s2320_s3 = inlined_call_operand.vmem [shape: f32[1,512], index: 3, kind: input, shape index: {}]   ;;  %s2321_s4 = inlined_call_operand.vmem [shape: f32[1,512], index: 4, kind: input, shape index: {}]   ;;  %s2322_s5 = inlined_call_operand.vmem [shape: bf16[512,16], index: 5, kind: input, shape index: {}]   ;;  %s2323_s6 = inlined_call_operand.vmem [shape: f32[1,16], index: 6, kind: input, shape index: {}]   ;;  %s2324_s7 = inlined_call_operand.hbm [shape: f32[2,8], index: 7, kind: output, shape index: {0}]   ;;  %s2325_s8 = inlined_call_operand.hbm [shape: f32[1,1], index: 8, kind: output, shape index: {1}]  }
   0x1   :  { %15 = vsyncpa [#allocation4], 0 }
   0x2   :  { %16 = vsyncpa [#allocation7], 0  ;;  %s1992_s27 = smov [#allocation2]  }
   0x3   :  { %s26_s28 = sshll.u32 %s1992_s27, 4  ;;  %s27_s28 = int_to_ptr.vmem [resolvable:$true] %s26_s28 }
   0x4   :  { %s1934_s29 = scalar_lea.vmem %s27_s28, 25600  ;;  %p1939_p1 = scmp.lt.s32.totalorder %s27_s28, %s27_s28 }
   0x5   :  { %p1935_p0 = scmp.ne.s32.totalorder %s27_s28, %s1934_s29  ;;  %p1940_p2 = scmp.lt.s32.totalorder %s1934_s29, %s1934_s29 }
   0x7   :  { %p1941_p3 = por %p1940_p2, %p1939_p1 }
   0x9   :  { %p1942_p4 = pnand %p1941_p3, %p1935_p0 }
   0xb   :  { %1945 = shalt.err (!%p1942_p4)
}
   0xc   :  { %s1993_s30 = smov 512   ;;  %s1994_s9 = smov 32  }
   0xd   :  { %32 = dma.hbm_to_vmem [thread:$0]  %s2319_s2, 25600, %s27_s28, [#allocation3], %s1993_s30, %s1993_s30, %s1994_s9  }
   0xe   :  { %1986 = dma.done.wait [#allocation3], 25600  }
   0xf   :  { %1987 = vsyncadd [#allocation3], 4294941696  ;;  %v156_v0 = vld [vmem:[#allocation2 + $0x68] sm:$0xff]  ;;  %v155_v2 = vld [vmem:[#allocation2 + $0x60] sm:$0xff]  ;;  %v1995_v18 = vmov 1983009808   ;;  %v63_v20 = vlaneseq }
  0x10   :  { %v188_v1 = vld [vmem:[#allocation2 + $0x168] sm:$0xff]  ;;  %v368_v3 = vunpack.c.l.s8.bf16 %v156_v0  ;;  %v372_v4 = vunpack.c.h.s8.bf16 %v156_v0  ;;  %v187_v7 = vld [vmem:[#allocation2 + $0x160] sm:$0xff]  ;;  %v371_v8 = vunpack.c.h.s8.bf16 %v155_v2  ;;  %v367_v12 = vunpack.c.l.s8.bf16 %v155_v2  ;;  %s1997_s11 = smov 8   ;;  %s1998_s2 = smov 120  }
  0x11   :  { %v432_v5 = vunpack.c.l.s8.bf16 %v188_v1  ;;  %v436_v6 = vunpack.c.h.s8.bf16 %v188_v1  ;;  %v435_v9 = vunpack.c.h.s8.bf16 %v187_v7  ;;  %v152_v10 = vld [vmem:[#allocation2 + $0x48] sm:$0xff]  ;;  %v431_v13 = vunpack.c.l.s8.bf16 %v187_v7  ;;  %v151_v16 = vld [vmem:[#allocation2 + $0x40] sm:$0xff]  ;;  %s2000_s13 = smov [#allocation6]  }
  0x12   :  { %v184_v11 = vld [vmem:[#allocation2 + $0x148] sm:$0xff]  ;;  %747 = vmatprep.subr.bf16.mxu0 %v372_v4  ;;  %v364_v14 = vunpack.c.h.s8.bf16 %v152_v10  ;;  %v183_v17 = vld [vmem:[#allocation2 + $0x140] sm:$0xff]  ;;  %v61_v19 = vunpack.c.l.s4 %v1995_v18  ;;  %v363_v21 = vunpack.c.h.s8.bf16 %v151_v16  ;;  %v360_v23 = vunpack.c.l.s8.bf16 %v152_v10  ;;  %s1783_s14 = sshll.u32 %s2000_s13, 4  ;;  %s1784_s14 = int_to_ptr.vmem [resolvable:$true] %s1783_s14 }
  0x13   :  { %788 = vmatprep.subr.bf16.mxu1 %v436_v6  ;;  %748 = vmatpush1.bf16.msra.mxu0 %v371_v8  ;;  %v428_v15 = vunpack.c.h.s8.bf16 %v184_v11  ;;  %v427_v22 = vunpack.c.h.s8.bf16 %v183_v17  ;;  %v424_v24 = vunpack.c.l.s8.bf16 %v184_v11  ;;  %v2050_v26 = vshrl.u32 %v63_v20, 7  ;;  %v148_v27 = vld [vmem:[#allocation2 + $0x28] sm:$0xff]  ;;  %v147_v33 = vld [vmem:[#allocation2 + $0x20] sm:$0xff]  ;;  %s1946_s15 = scalar_lea.vmem %s1784_s14, 16  ;;  %s1950_s16 = scalar_lea.vmem %s1784_s14, 32 }
  0x14   :  { %789 = vmatpush1.bf16.msra.mxu1 %v435_v9  ;;  %749 = vmatprep.subr.bf16.mxu0 %v368_v3  ;;  %v62_v25 = vunpack.c.0.s8 %v61_v19  ;;  %v180_v28 = vld [vmem:[#allocation2 + $0x128] sm:$0xff]  ;;  %v359_v29 = vunpack.c.l.s8.bf16 %v151_v16  ;;  %v423_v30 = vunpack.c.l.s8.bf16 %v183_v17  ;;  %v356_v31 = vunpack.c.h.s8.bf16 %v148_v27  ;;  %v179_v34 = vld [vmem:[#allocation2 + $0x120] sm:$0xff]  ;;  %p1947_p5 = scmp.ne.s32.totalorder %s1784_s14, %s1946_s15  ;;  %p1951_p6 = scmp.lt.s32.totalorder %s1784_s14, %s1784_s14 }
  0x15   :  { %790 = vmatprep.subr.bf16.mxu1 %v432_v5  ;;  %v420_v32 = vunpack.c.h.s8.bf16 %v180_v28  ;;  %v51_v36 = vld [vmem:[%s2317_s0] sm:$0xff]  ;;  %v355_v37 = vunpack.c.h.s8.bf16 %v147_v33  ;;  %v419_v38 = vunpack.c.h.s8.bf16 %v179_v34  ;;  %v352_v39 = vunpack.c.l.s8.bf16 %v148_v27  ;;  %v144_v43 = vld [vmem:[#allocation2 + $0x8] sm:$0xff]  ;;  %p1952_p7 = scmp.lt.s32.totalorder %s1950_s16, %s1946_s15 }
  0x16   :  { %v2053_v35 = vsub.s32 %v62_v25, %v2050_v26  ;;  %v416_v40 = vunpack.c.l.s8.bf16 %v180_v28  ;;  %v59_v42 = vcombine.high %v51_v36, %v51_v36  ;;  %v176_v44 = vld [vmem:[#allocation2 + $0x108] sm:$0xff]  ;;  %v351_v47 = vunpack.c.l.s8.bf16 %v147_v33  ;;  %v143_v51 = vld [vmem:[#allocation2] sm:$0xff] }
  0x17   :  { %750 = vmatpush1.bf16.msra.mxu0 %v367_v12  ;;  %v415_v48 = vunpack.c.l.s8.bf16 %v179_v34  ;;  %v348_v49 = vunpack.c.h.s8.bf16 %v144_v43  ;;  %v412_v50 = vunpack.c.h.s8.bf16 %v176_v44  ;;  %v175_v52 = vld [vmem:[#allocation2 + $0x100] sm:$0xff]  ;;  %v347_v56 = vunpack.c.h.s8.bf16 %v143_v51  ;;  %v172_v60 = vld [vmem:[#allocation2 + $0xe8] sm:$0xff]  ;;  %p1953_p8 = por %p1952_p7, %p1951_p6 }
  0x18   :  { %791 = vmatpush1.bf16.msra.mxu1 %v431_v13  ;;  %751 = vmatprep.subr.bf16.mxu0 %v364_v14  ;;  %v2059_v41 = vrot.slane %v51_v36, %v2053_v35  ;;  %v2064_v46 = vrot.slane %v59_v42, %v2053_v35  ;;  %v411_v57 = vunpack.c.h.s8.bf16 %v175_v52  ;;  %v344_v58 = vunpack.c.l.s8.bf16 %v144_v43  ;;  %v204_v61 = vld [vmem:[#allocation2 + $0x1e8] sm:$0xff]  ;;  %v171_v62 = vld [vmem:[#allocation2 + $0xe0] sm:$0xff] }
  0x19   :  { %792 = vmatprep.subr.bf16.mxu1 %v428_v15  ;;  %v408_v59 = vunpack.c.l.s8.bf16 %v176_v44  ;;  %v203_v63 = vld [vmem:[#allocation2 + $0x1e0] sm:$0xff]  ;;  %v343_v0 = vunpack.c.l.s8.bf16 %v143_v51  ;;  %v407_v1 = vunpack.c.l.s8.bf16 %v175_v52  ;;  %v404_v2 = vunpack.c.h.s8.bf16 %v172_v60  ;;  %v168_v8 = vld [vmem:[#allocation2 + $0xc8] sm:$0xff]  ;;  %p1954_p9 = pnand %p1953_p8, %p1947_p5 }
  0x1a   :  { %v74_v45 = vcombine.high %v2059_v41, %v2059_v41  ;;  %v75_v54 = vcombine.high %v2064_v46, %v2064_v46  ;;  %v468_v3 = vunpack.c.h.s8.bf16 %v204_v61  ;;  %v403_v4 = vunpack.c.h.s8.bf16 %v171_v62  ;;  %v200_v9 = vld [vmem:[#allocation2 + $0x1c8] sm:$0xff]  ;;  %v167_v10 = vld [vmem:[#allocation2 + $0xc0] sm:$0xff] }
  0x1b   :  { %752 = vmatpush1.bf16.msra.mxu0 %v363_v21  ;;  %v467_v5 = vunpack.c.h.s8.bf16 %v203_v63  ;;  %v400_v6 = vunpack.c.l.s8.bf16 %v172_v60  ;;  %v464_v7 = vunpack.c.l.s8.bf16 %v204_v61  ;;  %v199_v11 = vld [vmem:[#allocation2 + $0x1c0] sm:$0xff]  ;;  %v399_v12 = vunpack.c.l.s8.bf16 %v171_v62  ;;  %v164_v20 = vld [vmem:[#allocation2 + $0xa8] sm:$0xff] }
  0x1c   :  { %793 = vmatpush1.bf16.msra.mxu1 %v427_v22  ;;  %753 = vmatprep.subr.bf16.mxu0 %v360_v23  ;;  %v2066_v53 = vpack.c.bf16 %v74_v45, %v74_v45  ;;  %v2071_v55 = vpack.c.bf16 %v75_v54, %v75_v54  ;;  %v463_v13 = vunpack.c.l.s8.bf16 %v203_v63  ;;  %v396_v14 = vunpack.c.h.s8.bf16 %v168_v8  ;;  %v196_v21 = vld [vmem:[#allocation2 + $0x1a8] sm:$0xff]  ;;  %v163_v22 = vld [vmem:[#allocation2 + $0xa0] sm:$0xff] }
  0x1d   :  { %794 = vmatprep.subr.bf16.mxu1 %v424_v24  ;;  %v460_v15 = vunpack.c.h.s8.bf16 %v200_v9  ;;  %v395_v16 = vunpack.c.h.s8.bf16 %v167_v10  ;;  %v459_v17 = vunpack.c.h.s8.bf16 %v199_v11  ;;  %v392_v18 = vunpack.c.l.s8.bf16 %v168_v8  ;;  %v195_v23 = vld [vmem:[#allocation2 + $0x1a0] sm:$0xff]  ;;  %v192_v34 = vld [vmem:[#allocation2 + $0x188] sm:$0xff] }
  0x1e   :  { %779 = vmatprep.mubr.bf16.mxu0 %v2066_v53  ;;  %820 = vmatprep.mubr.bf16.mxu1 %v2071_v55  ;;  %v456_v19 = vunpack.c.l.s8.bf16 %v200_v9  ;;  %v391_v24 = vunpack.c.l.s8.bf16 %v167_v10  ;;  %v455_v25 = vunpack.c.l.s8.bf16 %v199_v11  ;;  %v388_v27 = vunpack.c.h.s8.bf16 %v164_v20  ;;  %v52_v36 = vld [vmem:[%s2317_s0 + $0x8] sm:$0xff]  ;;  %v159_v42 = vld [vmem:[#allocation2 + $0x80] sm:$0xff] }
  0x1f   :  { %754 = vmatpush1.bf16.msra.mxu0 %v359_v29  ;;  %v452_v28 = vunpack.c.h.s8.bf16 %v196_v21  ;;  %v387_v29 = vunpack.c.h.s8.bf16 %v163_v22  ;;  %v448_v33 = vunpack.c.l.s8.bf16 %v196_v21  ;;  %v191_v43 = vld [vmem:[#allocation2 + $0x180] sm:$0xff]  ;;  %v76_v44 = vcombine.high %v52_v36, %v52_v36  ;;  %v252_v51 = vld [vmem:[#allocation2 + $0x368] sm:$0xff] }
  0x20   :  { %795 = vmatpush1.bf16.msra.mxu1 %v423_v30  ;;  %755 = vmatprep.subr.bf16.mxu0 %v356_v31  ;;  %v451_v30 = vunpack.c.h.s8.bf16 %v195_v23  ;;  %v160_v31 = vld [vmem:[#allocation2 + $0x88] sm:$0xff]  ;;  %v379_v45 = vunpack.c.h.s8.bf16 %v159_v42  ;;  %v2078_v52 = vrot.slane %v52_v36, %v2053_v35  ;;  %v219_v60 = vld [vmem:[#allocation2 + $0x260] sm:$0xff]  ;;  %vm743_vm0 = vcmask 523264  }
  0x21   :  { %796 = vmatprep.subr.bf16.mxu1 %v420_v32  ;;  %v384_v32 = vunpack.c.l.s8.bf16 %v164_v20  ;;  %v2081_v54 = vrot.slane %v76_v44, %v2053_v35  ;;  %v251_v61 = vld [vmem:[#allocation2 + $0x360] sm:$0xff]  ;;  %vm1737_vm1 = vcmask 58368   ;;  %vm49_vm2 = vcmask 0  }
  0x22   :  { %v91_v62 = vcombine.high %v2078_v52, %v2078_v52 }
  0x23   :  { %756 = vmatpush1.bf16.msra.mxu0 %v355_v37  ;;  %v383_v37 = vunpack.c.l.s8.bf16 %v163_v22  ;;  %v92_v63 = vcombine.high %v2081_v54, %v2081_v54 }
  0x24   :  { %797 = vmatpush1.bf16.msra.mxu1 %v419_v38  ;;  %757 = vmatprep.subr.bf16.mxu0 %v352_v39  ;;  %v447_v38 = vunpack.c.l.s8.bf16 %v195_v23  ;;  %v380_v39 = vunpack.c.h.s8.bf16 %v160_v31  ;;  %v2095_v8 = vpack.c.bf16 %v91_v62, %v91_v62  ;;  %v232_v62 = vld [vmem:[#allocation2 + $0x2c8] sm:$0xff] }
  0x25   :  { %798 = vmatprep.subr.bf16.mxu1 %v416_v40  ;;  %v444_v40 = vunpack.c.h.s8.bf16 %v192_v34  ;;  %v2097_v9 = vpack.c.bf16 %v92_v63, %v92_v63  ;;  %v264_v63 = vld [vmem:[#allocation2 + $0x3c8] sm:$0xff] }
  0x27   :  { %758 = vmatpush1.bf16.msra.mxu0 %v351_v47  ;;  %v443_v47 = vunpack.c.h.s8.bf16 %v191_v43 }
  0x28   :  { %799 = vmatpush1.bf16.msra.mxu1 %v415_v48  ;;  %759 = vmatprep.subr.bf16.mxu0 %v348_v49  ;;  %v376_v48 = vunpack.c.l.s8.bf16 %v160_v31  ;;  %v440_v49 = vunpack.c.l.s8.bf16 %v192_v34  ;;  %v208_v31 = vld [vmem:[#allocation2 + $0x208] sm:$0xff] }
  0x29   :  { %800 = vmatprep.subr.bf16.mxu1 %v412_v50  ;;  %v220_v50 = vld [vmem:[#allocation2 + $0x268] sm:$0xff]  ;;  %v476_v36 = vunpack.c.h.s8.bf16 %v208_v31 }
  0x2b   :  { %760 = vmatpush1.bf16.msra.mxu0 %v347_v56  ;;  %v375_v56 = vunpack.c.l.s8.bf16 %v159_v42 }
  0x2c   :  { %801 = vmatpush1.bf16.msra.mxu1 %v411_v57  ;;  %761 = vmatprep.subr.bf16.mxu0 %v344_v58  ;;  %v439_v57 = vunpack.c.l.s8.bf16 %v191_v43  ;;  %v500_v58 = vunpack.c.h.s8.bf16 %v220_v50  ;;  %v472_v43 = vunpack.c.l.s8.bf16 %v208_v31 }
  0x2d   :  { %802 = vmatprep.subr.bf16.mxu1 %v408_v59  ;;  %v564_v59 = vunpack.c.h.s8.bf16 %v252_v51 }
  0x2f   :  { %762 = vmatpush1.bf16.msra.mxu0 %v343_v0  ;;  %v2089_v0 = vpack.c.bf16 %v2059_v41, %v2059_v41  ;;  %v495_v41 = vunpack.c.l.s8.bf16 %v219_v60 }
  0x30   :  { %803 = vmatpush1.bf16.msra.mxu1 %v407_v1  ;;  %763 = vmatprep.subr.bf16.mxu0 %v404_v2  ;;  %v2093_v1 = vpack.c.bf16 %v2064_v46, %v2064_v46  ;;  %v499_v2 = vunpack.c.h.s8.bf16 %v219_v60  ;;  %v559_v46 = vunpack.c.l.s8.bf16 %v251_v61 }
  0x31   :  { %804 = vmatprep.subr.bf16.mxu1 %v468_v3  ;;  %v563_v3 = vunpack.c.h.s8.bf16 %v251_v61 }
  0x33   :  { %764 = vmatpush2.bf16.msra.mxu0 %v403_v4  ;;  %v496_v4 = vunpack.c.l.s8.bf16 %v220_v50 }
  0x34   :  { %805 = vmatpush2.bf16.msra.mxu1 %v467_v5  ;;  %765 = vmatprep.subr.bf16.mxu0 %v400_v6  ;;  %v560_v5 = vunpack.c.l.s8.bf16 %v252_v51  ;;  %v216_v6 = vld [vmem:[#allocation2 + $0x248] sm:$0xff] }
  0x35   :  { %806 = vmatprep.subr.bf16.mxu1 %v464_v7  ;;  %v248_v7 = vld [vmem:[#allocation2 + $0x348] sm:$0xff]  ;;  %v492_v10 = vunpack.c.h.s8.bf16 %v216_v6 }
  0x36   :  { %v556_v11 = vunpack.c.h.s8.bf16 %v248_v7 }
  0x37   :  { %766 = vmatpush2.bf16.msra.mxu0 %v399_v12  ;;  %v215_v12 = vld [vmem:[#allocation2 + $0x240] sm:$0xff] }
  0x38   :  { %807 = vmatpush2.bf16.msra.mxu1 %v463_v13  ;;  %767 = vmatprep.subr.bf16.mxu0 %v396_v14  ;;  %v247_v13 = vld [vmem:[#allocation2 + $0x340] sm:$0xff]  ;;  %v491_v14 = vunpack.c.h.s8.bf16 %v215_v12  ;;  %v487_v20 = vunpack.c.l.s8.bf16 %v215_v12  ;;  %v228_v12 = vld [vmem:[#allocation2 + $0x2a8] sm:$0xff] }
  0x39   :  { %808 = vmatprep.subr.bf16.mxu1 %v460_v15  ;;  %v555_v15 = vunpack.c.h.s8.bf16 %v247_v13  ;;  %v551_v21 = vunpack.c.l.s8.bf16 %v247_v13  ;;  %v260_v13 = vld [vmem:[#allocation2 + $0x3a8] sm:$0xff] }
  0x3b   :  { %768 = vmatpush2.bf16.msra.mxu0 %v395_v16  ;;  %v488_v16 = vunpack.c.l.s8.bf16 %v216_v6  ;;  %v231_v6 = vld [vmem:[#allocation2 + $0x2c0] sm:$0xff] }
  0x3c   :  { %809 = vmatpush2.bf16.msra.mxu1 %v459_v17  ;;  %769 = vmatprep.subr.bf16.mxu0 %v392_v18  ;;  %v552_v17 = vunpack.c.l.s8.bf16 %v248_v7  ;;  %v212_v18 = vld [vmem:[#allocation2 + $0x228] sm:$0xff]  ;;  %v263_v7 = vld [vmem:[#allocation2 + $0x3c0] sm:$0xff] }
  0x3d   :  { %810 = vmatprep.subr.bf16.mxu1 %v456_v19  ;;  %v244_v19 = vld [vmem:[#allocation2 + $0x328] sm:$0xff]  ;;  %v484_v22 = vunpack.c.h.s8.bf16 %v212_v18 }
  0x3e   :  { %v548_v23 = vunpack.c.h.s8.bf16 %v244_v19 }
  0x3f   :  { %770 = vmatpush2.bf16.msra.mxu0 %v391_v24  ;;  %v211_v24 = vld [vmem:[#allocation2 + $0x220] sm:$0xff] }
  0x40   :  { %811 = vmatpush2.bf16.msra.mxu1 %v455_v25  ;;  %771 = vmatprep.subr.bf16.mxu0 %v388_v27  ;;  %v243_v25 = vld [vmem:[#allocation2 + $0x320] sm:$0xff]  ;;  %v483_v27 = vunpack.c.h.s8.bf16 %v211_v24 }
  0x41   :  { %812 = vmatprep.subr.bf16.mxu1 %v452_v28  ;;  %v547_v28 = vunpack.c.h.s8.bf16 %v243_v25  ;;  %v543_v34 = vunpack.c.l.s8.bf16 %v243_v25  ;;  %v256_v25 = vld [vmem:[#allocation2 + $0x388] sm:$0xff] }
  0x42   :  { %v572_v31 = vunpack.c.h.s8.bf16 %v256_v25 }
  0x43   :  { %772 = vmatpush2.bf16.msra.mxu0 %v387_v29  ;;  %v480_v29 = vunpack.c.l.s8.bf16 %v212_v18  ;;  %v227_v18 = vld [vmem:[#allocation2 + $0x2a0] sm:$0xff] }
  0x44   :  { %813 = vmatpush2.bf16.msra.mxu1 %v451_v30  ;;  %773 = vmatprep.subr.bf16.mxu0 %v384_v32  ;;  %v544_v30 = vunpack.c.l.s8.bf16 %v244_v19  ;;  %v240_v32 = vld [vmem:[#allocation2 + $0x308] sm:$0xff]  ;;  %v259_v19 = vld [vmem:[#allocation2 + $0x3a0] sm:$0xff] }
  0x45   :  { %814 = vmatprep.subr.bf16.mxu1 %v448_v33  ;;  %v479_v33 = vunpack.c.l.s8.bf16 %v211_v24  ;;  %v536_v44 = vunpack.c.l.s8.bf16 %v240_v32  ;;  %v224_v24 = vld [vmem:[#allocation2 + $0x288] sm:$0xff] }
  0x47   :  { %774 = vmatpush2.bf16.msra.mxu0 %v383_v37  ;;  %v540_v37 = vunpack.c.h.s8.bf16 %v240_v32  ;;  %v223_v32 = vld [vmem:[#allocation2 + $0x280] sm:$0xff] }
  0x48   :  { %815 = vmatpush2.bf16.msra.mxu1 %v447_v38  ;;  %775 = vmatprep.subr.bf16.mxu0 %v380_v39  ;;  %v207_v38 = vld [vmem:[#allocation2 + $0x200] sm:$0xff] }
  0x49   :  { %816 = vmatprep.subr.bf16.mxu1 %v444_v40  ;;  %v239_v39 = vld [vmem:[#allocation2 + $0x300] sm:$0xff]  ;;  %v475_v40 = vunpack.c.h.s8.bf16 %v207_v38 }
  0x4a   :  { %v539_v42 = vunpack.c.h.s8.bf16 %v239_v39 }
  0x4b   :  { %776 = vmatpush2.bf16.msra.mxu0 %v379_v45  ;;  %v236_v45 = vld [vmem:[#allocation2 + $0x2e8] sm:$0xff] }
  0x4c   :  { %817 = vmatpush2.bf16.msra.mxu1 %v443_v47  ;;  %777 = vmatprep.subr.bf16.mxu0 %v376_v48  ;;  %v268_v47 = vld [vmem:[#allocation2 + $0x3e8] sm:$0xff]  ;;  %v471_v48 = vunpack.c.l.s8.bf16 %v207_v38  ;;  %v532_v50 = vunpack.c.h.s8.bf16 %v236_v45  ;;  %v528_v60 = vunpack.c.l.s8.bf16 %v236_v45  ;;  %v504_v38 = vunpack.c.l.s8.bf16 %v224_v24 }
  0x4d   :  { %818 = vmatprep.subr.bf16.mxu1 %v440_v49  ;;  %v535_v49 = vunpack.c.l.s8.bf16 %v239_v39  ;;  %v596_v51 = vunpack.c.h.s8.bf16 %v268_v47  ;;  %v592_v61 = vunpack.c.l.s8.bf16 %v268_v47  ;;  %v568_v39 = vunpack.c.l.s8.bf16 %v256_v25  ;;  %v272_v25 = vld [vmem:[#allocation2 + $0x408] sm:$0xff] }
  0x4e   :  { %v503_v45 = vunpack.c.l.s8.bf16 %v223_v32 }
  0x4f   :  { %778 = vmatpush2.bf16.msra.mxu0 %v375_v56  ;;  %v235_v56 = vld [vmem:[#allocation2 + $0x2e0] sm:$0xff] }
  0x50   :  { %819 = vmatpush2.bf16.msra.mxu1 %v439_v57  ;;  %829 = vmatprep.subr.bf16.mxu0 %v500_v58  ;;  %v267_v57 = vld [vmem:[#allocation2 + $0x3e0] sm:$0xff]  ;;  %v531_v58 = vunpack.c.h.s8.bf16 %v235_v56 }
  0x51   :  { %870 = vmatprep.subr.bf16.mxu1 %v564_v59  ;;  %v595_v59 = vunpack.c.h.s8.bf16 %v267_v57 }
  0x52   :  { %780 = vmatmul.mubr.bf16.vlgmr.msra.gmra.mxu0 %v2089_v0 }
  0x53   :  { %821 = vmatmul.mubr.bf16.vlgmr.msra.gmra.mxu1 %v2093_v1  ;;  %830 = vmatpush1.bf16.msra.mxu0 %v499_v2  ;;  %v527_v2 = vunpack.c.l.s8.bf16 %v235_v56 }
  0x54   :  { %871 = vmatpush1.bf16.msra.mxu1 %v563_v3  ;;  %831 = vmatprep.subr.bf16.mxu0 %v496_v4  ;;  %v591_v3 = vunpack.c.l.s8.bf16 %v267_v57  ;;  %v524_v4 = vunpack.c.h.s8.bf16 %v232_v62 }
  0x55   :  { %872 = vmatprep.subr.bf16.mxu1 %v560_v5  ;;  %861 = vmatprep.mubr.bf16.mxu0 %v2095_v8  ;;  %v588_v5 = vunpack.c.h.s8.bf16 %v264_v63 }
  0x56   :  { %902 = vmatprep.mubr.bf16.mxu1 %v2097_v9 }
  0x57   :  { %832 = vmatpush1.bf16.msra.mxu0 %v495_v41  ;;  %v523_v41 = vunpack.c.h.s8.bf16 %v231_v6 }
  0x58   :  { %873 = vmatpush1.bf16.msra.mxu1 %v559_v46  ;;  %833 = vmatprep.subr.bf16.mxu0 %v492_v10  ;;  %v587_v46 = vunpack.c.h.s8.bf16 %v263_v7  ;;  %v520_v10 = vunpack.c.l.s8.bf16 %v232_v62 }
  0x59   :  { %874 = vmatprep.subr.bf16.mxu1 %v556_v11  ;;  %v584_v11 = vunpack.c.l.s8.bf16 %v264_v63  ;;  %v280_v63 = vld [vmem:[#allocation2 + $0x448] sm:$0xff] }
  0x5b   :  { %834 = vmatpush1.bf16.msra.mxu0 %v491_v14  ;;  %v519_v14 = vunpack.c.l.s8.bf16 %v231_v6 }
  0x5c   :  { %875 = vmatpush1.bf16.msra.mxu1 %v555_v15  ;;  %835 = vmatprep.subr.bf16.mxu0 %v488_v16  ;;  %v583_v15 = vunpack.c.l.s8.bf16 %v263_v7  ;;  %v516_v16 = vunpack.c.h.s8.bf16 %v228_v12  ;;  %v279_v7 = vld [vmem:[#allocation2 + $0x440] sm:$0xff] }
  0x5d   :  { %876 = vmatprep.subr.bf16.mxu1 %v552_v17  ;;  %v580_v17 = vunpack.c.h.s8.bf16 %v260_v13 }
  0x5f   :  { %836 = vmatpush1.bf16.msra.mxu0 %v487_v20  ;;  %v515_v20 = vunpack.c.h.s8.bf16 %v227_v18 }
  0x60   :  { %877 = vmatpush1.bf16.msra.mxu1 %v551_v21  ;;  %837 = vmatprep.subr.bf16.mxu0 %v484_v22  ;;  %v579_v21 = vunpack.c.h.s8.bf16 %v259_v19  ;;  %v512_v22 = vunpack.c.l.s8.bf16 %v228_v12 }
  0x61   :  { %878 = vmatprep.subr.bf16.mxu1 %v548_v23  ;;  %v576_v23 = vunpack.c.l.s8.bf16 %v260_v13  ;;  %v276_v13 = vld [vmem:[#allocation2 + $0x428] sm:$0xff] }
  0x63   :  { %838 = vmatpush1.bf16.msra.mxu0 %v483_v27  ;;  %v53_v27 = vld [vmem:[%s2317_s0 + $0x10] sm:$0xff] }
  0x64   :  { %879 = vmatpush1.bf16.msra.mxu1 %v547_v28  ;;  %839 = vmatprep.subr.bf16.mxu0 %v480_v29  ;;  %v511_v28 = vunpack.c.l.s8.bf16 %v227_v18  ;;  %v575_v29 = vunpack.c.l.s8.bf16 %v259_v19  ;;  %v275_v19 = vld [vmem:[#allocation2 + $0x420] sm:$0xff] }
  0x65   :  { %880 = vmatprep.subr.bf16.mxu1 %v544_v30  ;;  %v508_v30 = vunpack.c.h.s8.bf16 %v224_v24 }
  0x67   :  { %840 = vmatpush1.bf16.msra.mxu0 %v479_v33  ;;  %v255_v33 = vld [vmem:[#allocation2 + $0x380] sm:$0xff] }
  0x68   :  { %881 = vmatpush1.bf16.msra.mxu1 %v543_v34  ;;  %841 = vmatprep.subr.bf16.mxu0 %v476_v36  ;;  %v93_v34 = vcombine.high %v53_v27, %v53_v27  ;;  %v507_v36 = vunpack.c.h.s8.bf16 %v223_v32  ;;  %v567_v47 = vunpack.c.l.s8.bf16 %v255_v33  ;;  %v271_v32 = vld [vmem:[#allocation2 + $0x400] sm:$0xff] }
  0x69   :  { %882 = vmatprep.subr.bf16.mxu1 %v540_v37  ;;  %v571_v37 = vunpack.c.h.s8.bf16 %v255_v33  ;;  %v303_v33 = vld [vmem:[#allocation2 + $0x500] sm:$0xff] }
  0x6b   :  { %842 = vmatpush1.bf16.msra.mxu0 %v475_v40  ;;  %v284_v40 = vld [vmem:[#allocation2 + $0x468] sm:$0xff] }
  0x6c   :  { %883 = vmatpush1.bf16.msra.mxu1 %v539_v42  ;;  %843 = vmatprep.subr.bf16.mxu0 %v472_v43  ;;  %v316_v42 = vld [vmem:[#allocation2 + $0x568] sm:$0xff]  ;;  %v2107_v43 = vrot.slane %v53_v27, %v2053_v35 }
  0x6d   :  { %884 = vmatprep.subr.bf16.mxu1 %v536_v44  ;;  %v2110_v44 = vrot.slane %v93_v34, %v2053_v35  ;;  %v2118_v35 = vpack.c.bf16 %v2078_v52, %v2078_v52  ;;  %v688_v62 = vunpack.c.l.s8.bf16 %v316_v42  ;;  %v304_v27 = vld [vmem:[#allocation2 + $0x508] sm:$0xff]  ;;  %v603_v34 = vunpack.c.h.s8.bf16 %v271_v32 }
  0x6e   :  { %v108_v56 = vcombine.high %v2107_v43, %v2107_v43 }
  0x6f   :  { %844 = vmatpush1.bf16.msra.mxu0 %v471_v48  ;;  %v628_v48 = vunpack.c.h.s8.bf16 %v284_v40  ;;  %v109_v57 = vcombine.high %v2110_v44, %v2110_v44 }
  0x70   :  { %885 = vmatpush1.bf16.msra.mxu1 %v535_v49  ;;  %845 = vmatprep.subr.bf16.mxu0 %v532_v50  ;;  %v692_v49 = vunpack.c.h.s8.bf16 %v316_v42  ;;  %v283_v50 = vld [vmem:[#allocation2 + $0x460] sm:$0xff]  ;;  %v599_v42 = vunpack.c.l.s8.bf16 %v271_v32 }
  0x71   :  { %886 = vmatprep.subr.bf16.mxu1 %v596_v51  ;;  %v315_v51 = vld [vmem:[#allocation2 + $0x560] sm:$0xff]  ;;  %v623_v52 = vunpack.c.l.s8.bf16 %v283_v50 }
  0x73   :  { %846 = vmatpush2.bf16.msra.mxu0 %v531_v58  ;;  %v2122_v58 = vpack.c.bf16 %v2081_v54, %v2081_v54  ;;  %v687_v54 = vunpack.c.l.s8.bf16 %v315_v51 }
  0x74   :  { %887 = vmatpush2.bf16.msra.mxu1 %v595_v59  ;;  %847 = vmatprep.subr.bf16.mxu0 %v528_v60  ;;  %v627_v59 = vunpack.c.h.s8.bf16 %v283_v50  ;;  %v691_v60 = vunpack.c.h.s8.bf16 %v315_v51  ;;  %v331_v50 = vld [vmem:[#allocation2 + $0x5e0] sm:$0xff] }
  0x75   :  { %888 = vmatprep.subr.bf16.mxu1 %v592_v61  ;;  %v624_v61 = vunpack.c.l.s8.bf16 %v284_v40  ;;  %v332_v40 = vld [vmem:[#allocation2 + $0x5e8] sm:$0xff] }
  0x77   :  { %848 = vmatpush2.bf16.msra.mxu0 %v527_v2  ;;  %v312_v2 = vld [vmem:[#allocation2 + $0x548] sm:$0xff] }
  0x78   :  { %889 = vmatpush2.bf16.msra.mxu1 %v591_v3  ;;  %849 = vmatprep.subr.bf16.mxu0 %v524_v4  ;;  %v2124_v3 = vpack.c.bf16 %v108_v56, %v108_v56  ;;  %v2126_v4 = vpack.c.bf16 %v109_v57, %v109_v57  ;;  %v684_v6 = vunpack.c.h.s8.bf16 %v312_v2  ;;  %v680_v12 = vunpack.c.l.s8.bf16 %v312_v2 }
  0x79   :  { %890 = vmatprep.subr.bf16.mxu1 %v588_v5  ;;  %v620_v5 = vunpack.c.h.s8.bf16 %v280_v63  ;;  %v723_v56 = vunpack.c.h.s8.bf16 %v331_v50 }
  0x7b   :  { %850 = vmatpush2.bf16.msra.mxu0 %v523_v41  ;;  %v311_v41 = vld [vmem:[#allocation2 + $0x540] sm:$0xff] }
  0x7c   :  { %891 = vmatpush2.bf16.msra.mxu1 %v587_v46  ;;  %851 = vmatprep.subr.bf16.mxu0 %v520_v10  ;;  %v619_v46 = vunpack.c.h.s8.bf16 %v279_v7  ;;  %v683_v10 = vunpack.c.h.s8.bf16 %v311_v41 }
  0x7d   :  { %892 = vmatprep.subr.bf16.mxu1 %v584_v11  ;;  %v616_v11 = vunpack.c.l.s8.bf16 %v280_v63  ;;  %v719_v63 = vunpack.c.l.s8.bf16 %v331_v50 }
  0x7f   :  { %852 = vmatpush2.bf16.msra.mxu0 %v519_v14  ;;  %v308_v14 = vld [vmem:[#allocation2 + $0x528] sm:$0xff] }
  0x80   :  { %893 = vmatpush2.bf16.msra.mxu1 %v583_v15  ;;  %853 = vmatprep.subr.bf16.mxu0 %v516_v16  ;;  %v615_v15 = vunpack.c.l.s8.bf16 %v279_v7  ;;  %v679_v16 = vunpack.c.l.s8.bf16 %v311_v41  ;;  %v676_v18 = vunpack.c.h.s8.bf16 %v308_v14  ;;  %v672_v24 = vunpack.c.l.s8.bf16 %v308_v14 }
  0x81   :  { %894 = vmatprep.subr.bf16.mxu1 %v580_v17  ;;  %v612_v17 = vunpack.c.h.s8.bf16 %v276_v13 }
  0x83   :  { %854 = vmatpush2.bf16.msra.mxu0 %v515_v20  ;;  %v307_v20 = vld [vmem:[#allocation2 + $0x520] sm:$0xff] }
  0x84   :  { %895 = vmatpush2.bf16.msra.mxu1 %v579_v21  ;;  %855 = vmatprep.subr.bf16.mxu0 %v512_v22  ;;  %v611_v21 = vunpack.c.h.s8.bf16 %v275_v19  ;;  %v675_v22 = vunpack.c.h.s8.bf16 %v307_v20 }
  0x85   :  { %896 = vmatprep.subr.bf16.mxu1 %v576_v23  ;;  %v608_v23 = vunpack.c.l.s8.bf16 %v276_v13 }
  0x87   :  { %856 = vmatpush2.bf16.msra.mxu0 %v511_v28  ;;  %v607_v28 = vunpack.c.l.s8.bf16 %v275_v19 }
  0x88   :  { %897 = vmatpush2.bf16.msra.mxu1 %v575_v29  ;;  %857 = vmatprep.subr.bf16.mxu0 %v508_v30  ;;  %v671_v29 = vunpack.c.l.s8.bf16 %v307_v20  ;;  %v604_v30 = vunpack.c.h.s8.bf16 %v272_v25 }
  0x89   :  { %898 = vmatprep.subr.bf16.mxu1 %v572_v31  ;;  %v668_v31 = vunpack.c.h.s8.bf16 %v304_v27 }
  0x8b   :  { %858 = vmatpush2.bf16.msra.mxu0 %v507_v36  ;;  %v667_v36 = vunpack.c.h.s8.bf16 %v303_v33 }
  0x8c   :  { %899 = vmatpush2.bf16.msra.mxu1 %v571_v37  ;;  %859 = vmatprep.subr.bf16.mxu0 %v504_v38  ;;  %v600_v37 = vunpack.c.l.s8.bf16 %v272_v25  ;;  %v664_v38 = vunpack.c.l.s8.bf16 %v304_v27 }
  0x8d   :  { %900 = vmatprep.subr.bf16.mxu1 %v568_v39  ;;  %v300_v39 = vld [vmem:[#allocation2 + $0x4e8] sm:$0xff] }
  0x8e   :  { %v656_v57 = vunpack.c.l.s8.bf16 %v300_v39 }
  0x8f   :  { %860 = vmatpush2.bf16.msra.mxu0 %v503_v45  ;;  %v663_v45 = vunpack.c.l.s8.bf16 %v303_v33 }
  0x90   :  { %901 = vmatpush2.bf16.msra.mxu1 %v567_v47  ;;  %911 = vmatprep.subr.bf16.mxu0 %v628_v48  ;;  %v660_v47 = vunpack.c.h.s8.bf16 %v300_v39  ;;  %v724_v48 = vunpack.c.h.s8.bf16 %v332_v40 }
  0x91   :  { %952 = vmatprep.subr.bf16.mxu1 %v692_v49  ;;  %v299_v49 = vld [vmem:[#allocation2 + $0x4e0] sm:$0xff] }
  0x92   :  { %862 = vmatmul.mubr.bf16.vlgmr.msra.gmra.mxu0 %v2118_v35  ;;  %v659_v51 = vunpack.c.h.s8.bf16 %v299_v49 }
  0x93   :  { %903 = vmatmul.mubr.bf16.vlgmr.msra.gmra.mxu1 %v2122_v58  ;;  %912 = vmatpush1.bf16.msra.mxu0 %v627_v59  ;;  %v720_v59 = vunpack.c.l.s8.bf16 %v332_v40 }
  0x94   :  { %953 = vmatpush1.bf16.msra.mxu1 %v691_v60  ;;  %913 = vmatprep.subr.bf16.mxu0 %v624_v61  ;;  %v296_v60 = vld [vmem:[#allocation2 + $0x4c8] sm:$0xff] }
  0x95   :  { %954 = vmatprep.subr.bf16.mxu1 %v688_v62  ;;  %943 = vmatprep.mubr.bf16.mxu0 %v2124_v3  ;;  %v328_v61 = vld [vmem:[#allocation2 + $0x5c8] sm:$0xff]  ;;  %v655_v62 = vunpack.c.l.s8.bf16 %v299_v49  ;;  %v652_v2 = vunpack.c.h.s8.bf16 %v296_v60  ;;  %v648_v41 = vunpack.c.l.s8.bf16 %v296_v60  ;;  %v2138_v49 = vpack.c.bf16 %v2110_v44, %v2110_v44  ;;  %v154_v60 = vld [vmem:[#allocation2 + $0x58] sm:$0xff] }
  0x96   :  { %984 = vmatprep.mubr.bf16.mxu1 %v2126_v4 }
  0x97   :  { %914 = vmatpush1.bf16.msra.mxu0 %v623_v52  ;;  %v716_v52 = vunpack.c.h.s8.bf16 %v328_v61 }
  0x98   :  { %955 = vmatpush1.bf16.msra.mxu1 %v687_v54  ;;  %915 = vmatprep.subr.bf16.mxu0 %v620_v5  ;;  %v295_v54 = vld [vmem:[#allocation2 + $0x4c0] sm:$0xff] }
  0x99   :  { %956 = vmatprep.subr.bf16.mxu1 %v684_v6  ;;  %v327_v5 = vld [vmem:[#allocation2 + $0x5c0] sm:$0xff]  ;;  %v651_v6 = vunpack.c.h.s8.bf16 %v295_v54 }
  0x9a   :  { %v715_v7 = vunpack.c.h.s8.bf16 %v327_v5  ;;  %v711_v13 = vunpack.c.l.s8.bf16 %v327_v5 }
  0x9b   :  { %916 = vmatpush1.bf16.msra.mxu0 %v619_v46  ;;  %v712_v46 = vunpack.c.l.s8.bf16 %v328_v61 }
  0x9c   :  { %957 = vmatpush1.bf16.msra.mxu1 %v683_v10  ;;  %917 = vmatprep.subr.bf16.mxu0 %v616_v11  ;;  %v292_v10 = vld [vmem:[#allocation2 + $0x4a8] sm:$0xff] }
  0x9d   :  { %958 = vmatprep.subr.bf16.mxu1 %v680_v12  ;;  %v324_v11 = vld [vmem:[#allocation2 + $0x5a8] sm:$0xff]  ;;  %v647_v12 = vunpack.c.l.s8.bf16 %v295_v54  ;;  %v644_v14 = vunpack.c.h.s8.bf16 %v292_v10  ;;  %v640_v20 = vunpack.c.l.s8.bf16 %v292_v10 }
  0x9f   :  { %918 = vmatpush1.bf16.msra.mxu0 %v615_v15  ;;  %v708_v15 = vunpack.c.h.s8.bf16 %v324_v11 }
  0xa0   :  { %959 = vmatpush1.bf16.msra.mxu1 %v679_v16  ;;  %919 = vmatprep.subr.bf16.mxu0 %v612_v17  ;;  %v291_v16 = vld [vmem:[#allocation2 + $0x4a0] sm:$0xff] }
  0xa1   :  { %960 = vmatprep.subr.bf16.mxu1 %v676_v18  ;;  %v323_v17 = vld [vmem:[#allocation2 + $0x5a0] sm:$0xff]  ;;  %v643_v18 = vunpack.c.h.s8.bf16 %v291_v16 }
  0xa2   :  { %v707_v19 = vunpack.c.h.s8.bf16 %v323_v17  ;;  %v703_v25 = vunpack.c.l.s8.bf16 %v323_v17 }
  0xa3   :  { %920 = vmatpush1.bf16.msra.mxu0 %v611_v21  ;;  %v704_v21 = vunpack.c.l.s8.bf16 %v324_v11 }
  0xa4   :  { %961 = vmatpush1.bf16.msra.mxu1 %v675_v22  ;;  %921 = vmatprep.subr.bf16.mxu0 %v608_v23  ;;  %v288_v22 = vld [vmem:[#allocation2 + $0x488] sm:$0xff] }
  0xa5   :  { %962 = vmatprep.subr.bf16.mxu1 %v672_v24  ;;  %v320_v23 = vld [vmem:[#allocation2 + $0x588] sm:$0xff]  ;;  %v639_v24 = vunpack.c.l.s8.bf16 %v291_v16  ;;  %v636_v27 = vunpack.c.h.s8.bf16 %v288_v22  ;;  %v632_v33 = vunpack.c.l.s8.bf16 %v288_v22  ;;  %v186_v22 = vld [vmem:[#allocation2 + $0x158] sm:$0xff] }
  0xa7   :  { %922 = vmatpush1.bf16.msra.mxu0 %v607_v28  ;;  %v700_v28 = vunpack.c.h.s8.bf16 %v320_v23 }
  0xa8   :  { %963 = vmatpush1.bf16.msra.mxu1 %v671_v29  ;;  %923 = vmatprep.subr.bf16.mxu0 %v604_v30  ;;  %v287_v29 = vld [vmem:[#allocation2 + $0x480] sm:$0xff] }
  0xa9   :  { %964 = vmatprep.subr.bf16.mxu1 %v668_v31  ;;  %v319_v30 = vld [vmem:[#allocation2 + $0x580] sm:$0xff]  ;;  %v635_v31 = vunpack.c.h.s8.bf16 %v287_v29 }
  0xaa   :  { %v699_v32 = vunpack.c.h.s8.bf16 %v319_v30  ;;  %v695_v39 = vunpack.c.l.s8.bf16 %v319_v30 }
  0xab   :  { %924 = vmatpush1.bf16.msra.mxu0 %v603_v34  ;;  %v696_v34 = vunpack.c.l.s8.bf16 %v320_v23 }
  0xac   :  { %965 = vmatpush1.bf16.msra.mxu1 %v667_v36  ;;  %925 = vmatprep.subr.bf16.mxu0 %v600_v37  ;;  %v340_v36 = vld [vmem:[#allocation2 + $0x628] sm:$0xff]  ;;  %v158_v37 = vld [vmem:[#allocation2 + $0x78] sm:$0xff] }
  0xad   :  { %966 = vmatprep.subr.bf16.mxu1 %v664_v38  ;;  %v631_v38 = vunpack.c.l.s8.bf16 %v287_v29  ;;  %v740_v40 = vunpack.c.h.s8.bf16 %v340_v36  ;;  %v185_v29 = vld [vmem:[#allocation2 + $0x150] sm:$0xff] }
  0xaf   :  { %926 = vmatpush1.bf16.msra.mxu0 %v599_v42  ;;  %v374_v42 = vunpack.c.h.s8.bf16 %v158_v37 }
  0xb0   :  { %967 = vmatpush1.bf16.msra.mxu1 %v663_v45  ;;  %927 = vmatprep.subr.bf16.mxu0 %v660_v47  ;;  %v339_v45 = vld [vmem:[#allocation2 + $0x620] sm:$0xff]  ;;  %v157_v47 = vld [vmem:[#allocation2 + $0x70] sm:$0xff] }
  0xb1   :  { %968 = vmatprep.subr.bf16.mxu1 %v724_v48  ;;  %v2134_v48 = vpack.c.bf16 %v2107_v43, %v2107_v43  ;;  %v739_v50 = vunpack.c.h.s8.bf16 %v339_v45  ;;  %v735_v43 = vunpack.c.l.s8.bf16 %v339_v45  ;;  %v369_v61 = vunpack.c.l.s8.bf16 %v157_v47 }
  0xb3   :  { %928 = vmatpush2.bf16.msra.mxu0 %v659_v51  ;;  %v373_v51 = vunpack.c.h.s8.bf16 %v157_v47 }
  0xb4   :  { %969 = vmatpush2.bf16.msra.mxu1 %v723_v56  ;;  %929 = vmatprep.subr.bf16.mxu0 %v656_v57  ;;  %v736_v56 = vunpack.c.l.s8.bf16 %v340_v36  ;;  %v370_v57 = vunpack.c.l.s8.bf16 %v158_v37  ;;  %v182_v36 = vld [vmem:[#allocation2 + $0x138] sm:$0xff] }
  0xb5   :  { %970 = vmatprep.subr.bf16.mxu1 %v720_v59  ;;  %v336_v59 = vld [vmem:[#allocation2 + $0x608] sm:$0xff] }
  0xb6   :  { %v732_v44 = vunpack.c.h.s8.bf16 %v336_v59 }
  0xb7   :  { %930 = vmatpush2.bf16.msra.mxu0 %v655_v62  ;;  %v366_v62 = vunpack.c.h.s8.bf16 %v154_v60 }
  0xb8   :  { %971 = vmatpush2.bf16.msra.mxu1 %v719_v63  ;;  %931 = vmatprep.subr.bf16.mxu0 %v652_v2  ;;  %v335_v63 = vld [vmem:[#allocation2 + $0x600] sm:$0xff]  ;;  %v153_v2 = vld [vmem:[#allocation2 + $0x50] sm:$0xff] }
  0xb9   :  { %972 = vmatprep.subr.bf16.mxu1 %v716_v52  ;;  %v1996_v52 = vmov 0   ;;  %v731_v54 = vunpack.c.h.s8.bf16 %v335_v63  ;;  %v365_v5 = vunpack.c.h.s8.bf16 %v153_v2  ;;  %v727_v10 = vunpack.c.l.s8.bf16 %v335_v63 }
  0xba   :  { %v361_v11 = vunpack.c.l.s8.bf16 %v153_v2 }
  0xbb   :  { %932 = vmatpush2.bf16.msra.mxu0 %v651_v6  ;;  %v728_v6 = vunpack.c.l.s8.bf16 %v336_v59 }
  0xbc   :  { %973 = vmatpush2.bf16.msra.mxu1 %v715_v7  ;;  %933 = vmatprep.subr.bf16.mxu0 %v648_v41  ;;  %v362_v7 = vunpack.c.l.s8.bf16 %v154_v60  ;;  %v150_v41 = vld [vmem:[#allocation2 + $0x38] sm:$0xff] }
  0xbd   :  { %974 = vmatprep.subr.bf16.mxu1 %v712_v46  ;;  %v190_v46 = vld [vmem:[#allocation2 + $0x178] sm:$0xff] }
  0xbf   :  { %934 = vmatpush2.bf16.msra.mxu0 %v647_v12  ;;  %v1796_v12 = vld.sshfl [vmem:[%s2317_s0 + $0x18] sm:$0x3 pattern:$0x76325410] }
  0xc0   :  { %975 = vmatpush2.bf16.msra.mxu1 %v711_v13  ;;  %935 = vmatprep.subr.bf16.mxu0 %v644_v14  ;;  %v438_v13 = vunpack.c.h.s8.bf16 %v190_v46  ;;  %v149_v14 = vld [vmem:[#allocation2 + $0x30] sm:$0xff]  ;;  %v2147_v16 = vpack.c.bf16 %v1796_v12, %v1796_v12 }
  0xc1   :  { %976 = vmatprep.subr.bf16.mxu1 %v708_v15  ;;  %v189_v15 = vld [vmem:[#allocation2 + $0x170] sm:$0xff]  ;;  %v357_v17 = vunpack.c.h.s8.bf16 %v149_v14  ;;  %v353_v23 = vunpack.c.l.s8.bf16 %v149_v14 }
  0xc2   :  { %v165_v12 = vld [vmem:[#allocation2 + $0xb0] sm:$0xff] }
  0xc3   :  { %936 = vmatpush2.bf16.msra.mxu0 %v643_v18  ;;  %v437_v18 = vunpack.c.h.s8.bf16 %v189_v15 }
  0xc4   :  { %977 = vmatpush2.bf16.msra.mxu1 %v707_v19  ;;  %937 = vmatprep.subr.bf16.mxu0 %v640_v20  ;;  %v354_v19 = vunpack.c.l.s8.bf16 %v150_v41  ;;  %v434_v20 = vunpack.c.l.s8.bf16 %v190_v46 }
  0xc5   :  { %978 = vmatprep.subr.bf16.mxu1 %v704_v21  ;;  %v146_v21 = vld [vmem:[#allocation2 + $0x18] sm:$0xff] }
  0xc7   :  { %938 = vmatpush2.bf16.msra.mxu0 %v639_v24  ;;  %v433_v24 = vunpack.c.l.s8.bf16 %v189_v15 }
  0xc8   :  { %979 = vmatpush2.bf16.msra.mxu1 %v703_v25  ;;  %939 = vmatprep.subr.bf16.mxu0 %v636_v27  ;;  %v350_v25 = vunpack.c.h.s8.bf16 %v146_v21  ;;  %v430_v27 = vunpack.c.h.s8.bf16 %v186_v22 }
  0xc9   :  { %980 = vmatprep.subr.bf16.mxu1 %v700_v28  ;;  %v145_v28 = vld [vmem:[#allocation2 + $0x10] sm:$0xff] }
  0xca   :  { %v349_v30 = vunpack.c.h.s8.bf16 %v145_v28  ;;  %v345_v37 = vunpack.c.l.s8.bf16 %v145_v28 }
  0xcb   :  { %940 = vmatpush2.bf16.msra.mxu0 %v635_v31  ;;  %v429_v31 = vunpack.c.h.s8.bf16 %v185_v29 }
  0xcc   :  { %981 = vmatpush2.bf16.msra.mxu1 %v699_v32  ;;  %941 = vmatprep.subr.bf16.mxu0 %v632_v33  ;;  %v346_v32 = vunpack.c.l.s8.bf16 %v146_v21  ;;  %v426_v33 = vunpack.c.l.s8.bf16 %v186_v22 }
  0xcd   :  { %982 = vmatprep.subr.bf16.mxu1 %v696_v34  ;;  %v174_v34 = vld [vmem:[#allocation2 + $0xf8] sm:$0xff] }
  0xcf   :  { %942 = vmatpush2.bf16.msra.mxu0 %v631_v38  ;;  %v425_v38 = vunpack.c.l.s8.bf16 %v185_v29 }
  0xd0   :  { %983 = vmatpush2.bf16.msra.mxu1 %v695_v39  ;;  %1001 = vmatprep.subr.bf16.mxu0 %v740_v40  ;;  %v406_v39 = vunpack.c.h.s8.bf16 %v174_v34  ;;  %v422_v40 = vunpack.c.h.s8.bf16 %v182_v36 }
  0xd1   :  { %1034 = vmatprep.subr.bf16.mxu1 %v374_v42  ;;  %v173_v42 = vld [vmem:[#allocation2 + $0xf0] sm:$0xff] }
  0xd2   :  { %944 = vmatmul.mubr.bf16.vlgmr.msra.gmra.mxu0 %v2134_v48  ;;  %v405_v45 = vunpack.c.h.s8.bf16 %v173_v42  ;;  %v401_v59 = vunpack.c.l.s8.bf16 %v173_v42 }
  0xd3   :  { %985 = vmatmul.mubr.bf16.vlgmr.msra.gmra.mxu1 %v2138_v49  ;;  %1002 = vmatpush1.bf16.msra.mxu0 %v739_v50  ;;  %v402_v50 = vunpack.c.l.s8.bf16 %v174_v34 }
  0xd4   :  { %1035 = vmatpush1.bf16.msra.mxu1 %v373_v51  ;;  %1003 = vmatprep.subr.bf16.mxu0 %v736_v56  ;;  %v418_v51 = vunpack.c.l.s8.bf16 %v182_v36  ;;  %v170_v56 = vld [vmem:[#allocation2 + $0xd8] sm:$0xff] }
  0xd5   :  { %1036 = vmatprep.subr.bf16.mxu1 %v370_v57  ;;  %1025 = vmatprep.mubr.bf16.mxu0 %v1996_v52  ;;  %v178_v57 = vld [vmem:[#allocation2 + $0x118] sm:$0xff] }
  0xd6   :  { %1066 = vmatprep.mubr.bf16.mxu1 %v2066_v53  ;;  %v358_v53 = vunpack.c.h.s8.bf16 %v150_v41 }
  0xd7   :  { %1004 = vmatpush1.bf16.msra.mxu0 %v735_v43  ;;  %v398_v43 = vunpack.c.h.s8.bf16 %v170_v56 }
  0xd8   :  { %1037 = vmatpush1.bf16.msra.mxu1 %v369_v61  ;;  %1005 = vmatprep.subr.bf16.mxu0 %v732_v44  ;;  %v414_v61 = vunpack.c.h.s8.bf16 %v178_v57  ;;  %v169_v44 = vld [vmem:[#allocation2 + $0xd0] sm:$0xff] }
  0xd9   :  { %1038 = vmatprep.subr.bf16.mxu1 %v366_v62  ;;  %v177_v62 = vld [vmem:[#allocation2 + $0x110] sm:$0xff]  ;;  %v397_v63 = vunpack.c.h.s8.bf16 %v169_v44  ;;  %v393_v41 = vunpack.c.l.s8.bf16 %v169_v44 }
  0xda   :  { %v413_v2 = vunpack.c.h.s8.bf16 %v177_v62  ;;  %v409_v46 = vunpack.c.l.s8.bf16 %v177_v62 }
  0xdb   :  { %1006 = vmatpush1.bf16.msra.mxu0 %v731_v54  ;;  %v394_v54 = vunpack.c.l.s8.bf16 %v170_v56 }
  0xdc   :  { %1039 = vmatpush1.bf16.msra.mxu1 %v365_v5  ;;  %1007 = vmatprep.subr.bf16.mxu0 %v728_v6  ;;  %v410_v5 = vunpack.c.l.s8.bf16 %v178_v57  ;;  %v166_v6 = vld [vmem:[#allocation2 + $0xb8] sm:$0xff] }
  0xdd   :  { %1040 = vmatprep.subr.bf16.mxu1 %v362_v7  ;;  %v206_v7 = vld [vmem:[#allocation2 + $0x1f8] sm:$0xff]  ;;  %v386_v15 = vunpack.c.l.s8.bf16 %v166_v6 }
  0xdf   :  { %1008 = vmatpush1.bf16.msra.mxu0 %v727_v10  ;;  %v390_v10 = vunpack.c.h.s8.bf16 %v166_v6 }
  0xe0   :  { %1041 = vmatpush1.bf16.msra.mxu1 %v361_v11  ;;  %1075 = vmatprep.subr.bf16.mxu0 %v438_v13  ;;  %v470_v11 = vunpack.c.h.s8.bf16 %v206_v7  ;;  %v389_v13 = vunpack.c.h.s8.bf16 %v165_v12 }
  0xe1   :  { %1042 = vmatprep.subr.bf16.mxu1 %v358_v53  ;;  %v205_v53 = vld [vmem:[#allocation2 + $0x1f0] sm:$0xff] }
  0xe2   :  { %1797 = vmatmul.mubr.msk.bf16.vlgmr.msra.gmra.mxu0 %vm743_vm0, %v2147_v16  ;;  %v469_v14 = vunpack.c.h.s8.bf16 %v205_v53  ;;  %v465_v21 = vunpack.c.l.s8.bf16 %v205_v53  ;;  %v254_v53 = vld [vmem:[#allocation2 + $0x378] sm:$0xff] }
  0xe3   :  { %1076 = vmatpush1.bf16.msra.mxu0 %v437_v18  ;;  %1107 = vmatprep.mubr.bf16.mxu0 %v2071_v55  ;;  %v181_v55 = vld [vmem:[#allocation2 + $0x130] sm:$0xff]  ;;  %v162_v18 = vld [vmem:[#allocation2 + $0x98] sm:$0xff] }
  0xe4   :  { %1043 = vmatpush1.bf16.msra.mxu1 %v357_v17  ;;  %1077 = vmatprep.subr.bf16.mxu0 %v434_v20  ;;  %v421_v47 = vunpack.c.h.s8.bf16 %v181_v55  ;;  %v417_v60 = vunpack.c.l.s8.bf16 %v181_v55  ;;  %v466_v17 = vunpack.c.l.s8.bf16 %v206_v7  ;;  %v385_v20 = vunpack.c.l.s8.bf16 %v165_v12  ;;  %v214_v12 = vld [vmem:[#allocation2 + $0x238] sm:$0xff] }
  0xe5   :  { %1044 = vmatprep.subr.bf16.mxu1 %v354_v19  ;;  %v202_v19 = vld [vmem:[#allocation2 + $0x1d8] sm:$0xff]  ;;  %v382_v22 = vunpack.c.h.s8.bf16 %v162_v18  ;;  %v378_v29 = vunpack.c.l.s8.bf16 %v162_v18  ;;  %v253_v18 = vld [vmem:[#allocation2 + $0x370] sm:$0xff] }
  0xe7   :  { %1078 = vmatpush1.bf16.msra.mxu0 %v433_v24  ;;  %v161_v24 = vld [vmem:[#allocation2 + $0x90] sm:$0xff] }
  0xe8   :  { %1045 = vmatpush1.bf16.msra.mxu1 %v353_v23  ;;  %1079 = vmatprep.subr.bf16.mxu0 %v430_v27  ;;  %v462_v23 = vunpack.c.h.s8.bf16 %v202_v19  ;;  %v381_v27 = vunpack.c.h.s8.bf16 %v161_v24 }
  0xe9   :  { %1046 = vmatprep.subr.bf16.mxu1 %v350_v25  ;;  %v201_v25 = vld [vmem:[#allocation2 + $0x1d0] sm:$0xff] }
  0xea   :  { %v461_v28 = vunpack.c.h.s8.bf16 %v201_v25  ;;  %v457_v34 = vunpack.c.l.s8.bf16 %v201_v25 }
  0xeb   :  { %1080 = vmatpush1.bf16.msra.mxu0 %v429_v31  ;;  %v198_v31 = vld [vmem:[#allocation2 + $0x1b8] sm:$0xff] }
  0xec   :  { %1047 = vmatpush1.bf16.msra.mxu1 %v349_v30  ;;  %1081 = vmatprep.subr.bf16.mxu0 %v426_v33  ;;  %v458_v30 = vunpack.c.l.s8.bf16 %v202_v19  ;;  %v377_v33 = vunpack.c.l.s8.bf16 %v161_v24  ;;  %v454_v36 = vunpack.c.h.s8.bf16 %v198_v31  ;;  %v450_v55 = vunpack.c.l.s8.bf16 %v198_v31  ;;  %v250_v24 = vld [vmem:[#allocation2 + $0x358] sm:$0xff]  ;;  %v249_v31 = vld [vmem:[#allocation2 + $0x350] sm:$0xff] }
  0xed   :  { %1048 = vmatprep.subr.bf16.mxu1 %v346_v32  ;;  %v222_v32 = vld [vmem:[#allocation2 + $0x278] sm:$0xff] }
  0xef   :  { %1082 = vmatpush1.bf16.msra.mxu0 %v425_v38  ;;  %v197_v38 = vld [vmem:[#allocation2 + $0x1b0] sm:$0xff] }
  0xf0   :  { %1049 = vmatpush1.bf16.msra.mxu1 %v345_v37  ;;  %1083 = vmatprep.subr.bf16.mxu0 %v422_v40  ;;  %v502_v37 = vunpack.c.h.s8.bf16 %v222_v32  ;;  %v453_v40 = vunpack.c.h.s8.bf16 %v197_v38 }
  0xf1   :  { %1050 = vmatprep.subr.bf16.mxu1 %v406_v39  ;;  %v221_v39 = vld [vmem:[#allocation2 + $0x270] sm:$0xff] }
  0xf2   :  { %v501_v42 = vunpack.c.h.s8.bf16 %v221_v39 }
  0xf3   :  { %1084 = vmatpush1.bf16.msra.mxu0 %v421_v47  ;;  %v194_v47 = vld [vmem:[#allocation2 + $0x198] sm:$0xff] }
  0xf4   :  { %1051 = vmatpush2.bf16.msra.mxu1 %v405_v45  ;;  %1085 = vmatprep.subr.bf16.mxu0 %v418_v51  ;;  %v498_v45 = vunpack.c.l.s8.bf16 %v222_v32  ;;  %v446_v44 = vunpack.c.h.s8.bf16 %v194_v47 }
  0xf5   :  { %1052 = vmatprep.subr.bf16.mxu1 %v402_v50  ;;  %v218_v50 = vld [vmem:[#allocation2 + $0x258] sm:$0xff] }
  0xf6   :  { %v494_v62 = vunpack.c.h.s8.bf16 %v218_v50 }
  0xf7   :  { %1086 = vmatpush1.bf16.msra.mxu0 %v417_v60  ;;  %v497_v60 = vunpack.c.l.s8.bf16 %v221_v39  ;;  %v553_v39 = vunpack.c.l.s8.bf16 %v249_v31 }
  0xf8   :  { %1053 = vmatpush2.bf16.msra.mxu1 %v401_v59  ;;  %1087 = vmatprep.subr.bf16.mxu0 %v414_v61  ;;  %v449_v59 = vunpack.c.l.s8.bf16 %v197_v38 }
  0xf9   :  { %1054 = vmatprep.subr.bf16.mxu1 %v398_v43 }
  0xfb   :  { %1088 = vmatpush1.bf16.msra.mxu0 %v413_v2  ;;  %v217_v2 = vld [vmem:[#allocation2 + $0x250] sm:$0xff] }
  0xfc   :  { %1055 = vmatpush2.bf16.msra.mxu1 %v397_v63  ;;  %1089 = vmatprep.subr.bf16.mxu0 %v410_v5  ;;  %v193_v63 = vld [vmem:[#allocation2 + $0x190] sm:$0xff]  ;;  %v493_v7 = vunpack.c.h.s8.bf16 %v217_v2 }
  0xfd   :  { %1056 = vmatprep.subr.bf16.mxu1 %v394_v54  ;;  %v445_v6 = vunpack.c.h.s8.bf16 %v193_v63 }
  0xff   :  { %1090 = vmatpush1.bf16.msra.mxu0 %v409_v46 }
 0x100   :  { %1057 = vmatpush2.bf16.msra.mxu1 %v393_v41  ;;  %1091 = vmatprep.subr.bf16.mxu0 %v470_v11  ;;  %v490_v11 = vunpack.c.l.s8.bf16 %v218_v50 }
 0x101   :  { %1058 = vmatprep.subr.bf16.mxu1 %v390_v10  ;;  %v442_v10 = vunpack.c.l.s8.bf16 %v194_v47 }
 0x103   :  { %1092 = vmatpush2.bf16.msra.mxu0 %v469_v14  ;;  %v489_v14 = vunpack.c.l.s8.bf16 %v217_v2 }
 0x104   :  { %1059 = vmatpush2.bf16.msra.mxu1 %v389_v13  ;;  %1093 = vmatprep.subr.bf16.mxu0 %v466_v17  ;;  %v441_v13 = vunpack.c.l.s8.bf16 %v193_v63  ;;  %v213_v17 = vld [vmem:[#allocation2 + $0x230] sm:$0xff] }
 0x105   :  { %1060 = vmatprep.subr.bf16.mxu1 %v386_v15  ;;  %v566_v15 = vunpack.c.h.s8.bf16 %v254_v53  ;;  %v485_v19 = vunpack.c.h.s8.bf16 %v213_v17  ;;  %v481_v25 = vunpack.c.l.s8.bf16 %v213_v17  ;;  %v241_v63 = vld [vmem:[#allocation2 + $0x310] sm:$0xff] }
 0x107   :  { %1094 = vmatpush2.bf16.msra.mxu0 %v465_v21  ;;  %v482_v21 = vunpack.c.l.s8.bf16 %v214_v12 }
 0x108   :  { %1061 = vmatpush2.bf16.msra.mxu1 %v385_v20  ;;  %1095 = vmatprep.subr.bf16.mxu0 %v462_v23  ;;  %v565_v20 = vunpack.c.h.s8.bf16 %v253_v18  ;;  %v210_v23 = vld [vmem:[#allocation2 + $0x218] sm:$0xff] }
 0x109   :  { %1062 = vmatprep.subr.bf16.mxu1 %v382_v22  ;;  %v562_v22 = vunpack.c.l.s8.bf16 %v254_v53  ;;  %v229_v53 = vld [vmem:[#allocation2 + $0x2b0] sm:$0xff] }
 0x10b   :  { %1096 = vmatpush2.bf16.msra.mxu0 %v461_v28  ;;  %v478_v28 = vunpack.c.h.s8.bf16 %v210_v23 }
 0x10c   :  { %1063 = vmatpush2.bf16.msra.mxu1 %v381_v27  ;;  %1097 = vmatprep.subr.bf16.mxu0 %v458_v30  ;;  %v561_v27 = vunpack.c.l.s8.bf16 %v253_v18  ;;  %v209_v30 = vld [vmem:[#allocation2 + $0x210] sm:$0xff]  ;;  %v226_v18 = vld [vmem:[#allocation2 + $0x298] sm:$0xff] }
 0x10d   :  { %1064 = vmatprep.subr.bf16.mxu1 %v378_v29  ;;  %v558_v29 = vunpack.c.h.s8.bf16 %v250_v24  ;;  %v477_v32 = vunpack.c.h.s8.bf16 %v209_v30  ;;  %v473_v38 = vunpack.c.l.s8.bf16 %v209_v30 }
 0x10f   :  { %1098 = vmatpush2.bf16.msra.mxu0 %v457_v34  ;;  %v474_v34 = vunpack.c.l.s8.bf16 %v210_v23 }
 0x110   :  { %1065 = vmatpush2.bf16.msra.mxu1 %v377_v33  ;;  %1099 = vmatprep.subr.bf16.mxu0 %v454_v36  ;;  %v557_v33 = vunpack.c.h.s8.bf16 %v249_v31  ;;  %v238_v36 = vld [vmem:[#allocation2 + $0x2f8] sm:$0xff] }
 0x111   :  { %1116 = vmatprep.subr.bf16.mxu1 %v502_v37  ;;  %v246_v37 = vld [vmem:[#allocation2 + $0x338] sm:$0xff]  ;;  %v530_v50 = vunpack.c.l.s8.bf16 %v238_v36 }
 0x112   :  { %v781_v51 = vpop.f32.mrf.mxu0  ;;  %v262_v31 = vld [vmem:[#allocation2 + $0x3b8] sm:$0xff] }
 0x113   :  { %v822_v56 = vpop.f32.mrf.mxu1  ;;  %1067 = vmatmul.mubr.bf16.vlgmr.msra.gmra.mxu1 %v2089_v0  ;;  %1100 = vmatpush2.bf16.msra.mxu0 %v453_v40  ;;  %v534_v40 = vunpack.c.h.s8.bf16 %v238_v36 }
 0x114   :  { %v2153_v57 = vadd.f32 %v822_v56, %v781_v51  ;;  %1117 = vmatpush1.bf16.msra.mxu1 %v501_v42  ;;  %v783_v43 = vpop.f32.mrf.mxu0  ;;  %1101 = vmatprep.subr.bf16.mxu0 %v450_v55  ;;  %v550_v42 = vunpack.c.h.s8.bf16 %v246_v37  ;;  %v237_v55 = vld [vmem:[#allocation2 + $0x2f0] sm:$0xff]  ;;  %v546_v51 = vunpack.c.l.s8.bf16 %v246_v37  ;;  %v234_v56 = vld [vmem:[#allocation2 + $0x2d8] sm:$0xff] }
 0x115   :  { %v824_v61 = vpop.f32.mrf.mxu1  ;;  %1118 = vmatprep.subr.bf16.mxu1 %v498_v45  ;;  %1148 = vmatprep.mubr.bf16.mxu1 %v2095_v8  ;;  %v486_v8 = vunpack.c.h.s8.bf16 %v214_v12  ;;  %v533_v45 = vunpack.c.h.s8.bf16 %v237_v55  ;;  %v261_v37 = vld [vmem:[#allocation2 + $0x3b0] sm:$0xff] }
 0x116   :  { %v2155_v54 = vadd.f32 %v824_v61, %v783_v43  ;;  %v785_v5 = vpop.f32.mrf.mxu0  ;;  %v526_v61 = vunpack.c.h.s8.bf16 %v234_v56 }
 0x117   :  { %v826_v0 = vpop.f32.mrf.mxu1  ;;  %1102 = vmatpush2.bf16.msra.mxu0 %v449_v59  ;;  %v242_v59 = vld [vmem:[#allocation2 + $0x318] sm:$0xff]  ;;  %v541_v5 = vunpack.c.h.s8.bf16 %v241_v63 }
 0x118   :  { %1119 = vmatpush1.bf16.msra.mxu1 %v497_v60  ;;  %v786_v41 = vpop.f32.mrf.mxu0  ;;  %1103 = vmatprep.subr.bf16.mxu0 %v446_v44  ;;  %v529_v60 = vunpack.c.l.s8.bf16 %v237_v55  ;;  %v542_v44 = vunpack.c.h.s8.bf16 %v242_v59  ;;  %v522_v0 = vunpack.c.l.s8.bf16 %v234_v56  ;;  %v577_v56 = vunpack.c.l.s8.bf16 %v261_v37 }
 0x119   :  { %v827_v46 = vpop.f32.mrf.mxu1  ;;  %1120 = vmatprep.subr.bf16.mxu1 %v494_v62  ;;  %v233_v62 = vld [vmem:[#allocation2 + $0x2d0] sm:$0xff]  ;;  %v270_v41 = vld [vmem:[#allocation2 + $0x3f8] sm:$0xff] }
 0x11a   :  { %v525_v2 = vunpack.c.h.s8.bf16 %v233_v62  ;;  %v521_v46 = vunpack.c.l.s8.bf16 %v233_v62  ;;  %v598_v12 = vunpack.c.h.s8.bf16 %v270_v41  ;;  %v594_v17 = vunpack.c.l.s8.bf16 %v270_v41  ;;  %v257_v62 = vld [vmem:[#allocation2 + $0x390] sm:$0xff] }
 0x11b   :  { %1104 = vmatpush2.bf16.msra.mxu0 %v445_v6  ;;  %v538_v6 = vunpack.c.l.s8.bf16 %v242_v59 }
 0x11c   :  { %1121 = vmatpush1.bf16.msra.mxu1 %v493_v7  ;;  %1105 = vmatprep.subr.bf16.mxu0 %v442_v10  ;;  %v230_v7 = vld [vmem:[#allocation2 + $0x2b8] sm:$0xff]  ;;  %v537_v10 = vunpack.c.l.s8.bf16 %v241_v63  ;;  %v281_v63 = vld [vmem:[#allocation2 + $0x450] sm:$0xff] }
 0x11d   :  { %1122 = vmatprep.subr.bf16.mxu1 %v490_v11  ;;  %v518_v11 = vunpack.c.h.s8.bf16 %v230_v7 }
 0x11f   :  { %1106 = vmatpush2.bf16.msra.mxu0 %v441_v13  ;;  %v269_v13 = vld [vmem:[#allocation2 + $0x3f0] sm:$0xff] }
 0x120   :  { %1123 = vmatpush1.bf16.msra.mxu1 %v489_v14  ;;  %1157 = vmatprep.subr.bf16.mxu0 %v566_v15  ;;  %v517_v14 = vunpack.c.h.s8.bf16 %v229_v53  ;;  %v514_v15 = vunpack.c.l.s8.bf16 %v230_v7  ;;  %v621_v7 = vunpack.c.h.s8.bf16 %v281_v63 }
 0x121   :  { %1124 = vmatprep.subr.bf16.mxu1 %v486_v8  ;;  %v597_v8 = vunpack.c.h.s8.bf16 %v269_v13 }
 0x122   :  { %1108 = vmatmul.mubr.bf16.vlgmr.msra.gmra.mxu0 %v2093_v1  ;;  %v554_v1 = vunpack.c.l.s8.bf16 %v250_v24  ;;  %v225_v24 = vld [vmem:[#allocation2 + $0x290] sm:$0xff] }
 0x123   :  { %1158 = vmatpush1.bf16.msra.mxu0 %v565_v20  ;;  %1189 = vmatprep.mubr.bf16.mxu0 %v2097_v9  ;;  %v245_v9 = vld [vmem:[#allocation2 + $0x330] sm:$0xff]  ;;  %v513_v20 = vunpack.c.l.s8.bf16 %v229_v53  ;;  %v318_v53 = vld [vmem:[#allocation2 + $0x578] sm:$0xff] }
 0x124   :  { %1125 = vmatpush1.bf16.msra.mxu1 %v485_v19  ;;  %1159 = vmatprep.subr.bf16.mxu0 %v562_v22  ;;  %v549_v47 = vunpack.c.h.s8.bf16 %v245_v9  ;;  %v545_v43 = vunpack.c.l.s8.bf16 %v245_v9  ;;  %v266_v19 = vld [vmem:[#allocation2 + $0x3d8] sm:$0xff]  ;;  %v510_v22 = vunpack.c.h.s8.bf16 %v226_v18 }
 0x125   :  { %1126 = vmatprep.subr.bf16.mxu1 %v482_v21  ;;  %v593_v21 = vunpack.c.l.s8.bf16 %v269_v13  ;;  %v590_v23 = vunpack.c.h.s8.bf16 %v266_v19  ;;  %v586_v30 = vunpack.c.l.s8.bf16 %v266_v19  ;;  %v258_v9 = vld [vmem:[#allocation2 + $0x398] sm:$0xff] }
 0x127   :  { %1160 = vmatpush1.bf16.msra.mxu0 %v561_v27  ;;  %v509_v27 = vunpack.c.h.s8.bf16 %v225_v24 }
 0x128   :  { %1127 = vmatpush1.bf16.msra.mxu1 %v481_v25  ;;  %1161 = vmatprep.subr.bf16.mxu0 %v558_v29  ;;  %v265_v25 = vld [vmem:[#allocation2 + $0x3d0] sm:$0xff]  ;;  %v506_v29 = vunpack.c.l.s8.bf16 %v226_v18 }
 0x129   :  { %1128 = vmatprep.subr.bf16.mxu1 %v478_v28  ;;  %v589_v28 = vunpack.c.h.s8.bf16 %v265_v25 }
 0x12b   :  { %1162 = vmatpush1.bf16.msra.mxu0 %v557_v33  ;;  %v505_v33 = vunpack.c.l.s8.bf16 %v225_v24 }
 0x12c   :  { %1129 = vmatpush1.bf16.msra.mxu1 %v477_v32  ;;  %1163 = vmatprep.subr.bf16.mxu0 %v554_v1  ;;  %v286_v32 = vld [vmem:[#allocation2 + $0x478] sm:$0xff]  ;;  %v582_v1 = vunpack.c.h.s8.bf16 %v262_v31 }
 0x12d   :  { %1130 = vmatprep.subr.bf16.mxu1 %v474_v34  ;;  %v585_v34 = vunpack.c.l.s8.bf16 %v265_v25  ;;  %v630_v36 = vunpack.c.h.s8.bf16 %v286_v32  ;;  %v626_v55 = vunpack.c.l.s8.bf16 %v286_v32 }
 0x12f   :  { %1164 = vmatpush1.bf16.msra.mxu0 %v553_v39  ;;  %v581_v39 = vunpack.c.h.s8.bf16 %v261_v37 }
 0x130   :  { %1131 = vmatpush1.bf16.msra.mxu1 %v473_v38  ;;  %1165 = vmatprep.subr.bf16.mxu0 %v550_v42  ;;  %v285_v38 = vld [vmem:[#allocation2 + $0x470] sm:$0xff]  ;;  %v578_v42 = vunpack.c.l.s8.bf16 %v262_v31 }
 0x131   :  { %1132 = vmatprep.subr.bf16.mxu1 %v534_v40  ;;  %v629_v40 = vunpack.c.h.s8.bf16 %v285_v38  ;;  %v625_v59 = vunpack.c.l.s8.bf16 %v285_v38 }
 0x133   :  { %1166 = vmatpush1.bf16.msra.mxu0 %v549_v47 }
 0x134   :  { %1133 = vmatpush2.bf16.msra.mxu1 %v533_v45  ;;  %1167 = vmatprep.subr.bf16.mxu0 %v546_v51  ;;  %v282_v45 = vld [vmem:[#allocation2 + $0x458] sm:$0xff] }
 0x135   :  { %1134 = vmatprep.subr.bf16.mxu1 %v530_v50 }
 0x137   :  { %1168 = vmatpush1.bf16.msra.mxu0 %v545_v43 }
 0x138   :  { %1135 = vmatpush2.bf16.msra.mxu1 %v529_v60  ;;  %1169 = vmatprep.subr.bf16.mxu0 %v542_v44  ;;  %v622_v44 = vunpack.c.h.s8.bf16 %v282_v45 }
 0x139   :  { %1136 = vmatprep.subr.bf16.mxu1 %v526_v61  ;;  %v574_v61 = vunpack.c.h.s8.bf16 %v258_v9 }
 0x13b   :  { %1170 = vmatpush1.bf16.msra.mxu0 %v541_v5 }
 0x13c   :  { %1137 = vmatpush2.bf16.msra.mxu1 %v525_v2  ;;  %1171 = vmatprep.subr.bf16.mxu0 %v538_v6  ;;  %v573_v6 = vunpack.c.h.s8.bf16 %v257_v62 }
 0x13d   :  { %1138 = vmatprep.subr.bf16.mxu1 %v522_v0 }
 0x13f   :  { %1172 = vmatpush1.bf16.msra.mxu0 %v537_v10  ;;  %v570_v10 = vunpack.c.l.s8.bf16 %v258_v9 }
 0x140   :  { %1139 = vmatpush2.bf16.msra.mxu1 %v521_v46  ;;  %1173 = vmatprep.subr.bf16.mxu0 %v598_v12  ;;  %v278_v12 = vld [vmem:[#allocation2 + $0x438] sm:$0xff] }
 0x141   :  { %1140 = vmatprep.subr.bf16.mxu1 %v518_v11  ;;  %v618_v11 = vunpack.c.l.s8.bf16 %v282_v45  ;;  %v614_v13 = vunpack.c.h.s8.bf16 %v278_v12  ;;  %v610_v19 = vunpack.c.l.s8.bf16 %v278_v12  ;;  %v298_v45 = vld [vmem:[#allocation2 + $0x4d8] sm:$0xff] }
 0x143   :  { %1174 = vmatpush2.bf16.msra.mxu0 %v597_v8  ;;  %v277_v8 = vld [vmem:[#allocation2 + $0x430] sm:$0xff] }
 0x144   :  { %1141 = vmatpush2.bf16.msra.mxu1 %v517_v14  ;;  %1175 = vmatprep.subr.bf16.mxu0 %v594_v17  ;;  %v694_v14 = vunpack.c.h.s8.bf16 %v318_v53  ;;  %v613_v17 = vunpack.c.h.s8.bf16 %v277_v8 }
 0x145   :  { %1142 = vmatprep.subr.bf16.mxu1 %v514_v15  ;;  %v317_v15 = vld [vmem:[#allocation2 + $0x570] sm:$0xff] }
 0x146   :  { %v693_v18 = vunpack.c.h.s8.bf16 %v317_v15  ;;  %v689_v24 = vunpack.c.l.s8.bf16 %v317_v15 }
 0x147   :  { %1176 = vmatpush2.bf16.msra.mxu0 %v593_v21  ;;  %v274_v21 = vld [vmem:[#allocation2 + $0x418] sm:$0xff] }
 0x148   :  { %1143 = vmatpush2.bf16.msra.mxu1 %v513_v20  ;;  %1177 = vmatprep.subr.bf16.mxu0 %v590_v23  ;;  %v690_v20 = vunpack.c.l.s8.bf16 %v318_v53  ;;  %v609_v23 = vunpack.c.l.s8.bf16 %v277_v8  ;;  %v606_v25 = vunpack.c.h.s8.bf16 %v274_v21  ;;  %v602_v32 = vunpack.c.l.s8.bf16 %v274_v21 }
 0x149   :  { %1144 = vmatprep.subr.bf16.mxu1 %v510_v22  ;;  %v314_v22 = vld [vmem:[#allocation2 + $0x558] sm:$0xff] }
 0x14b   :  { %1178 = vmatpush2.bf16.msra.mxu0 %v589_v28  ;;  %v273_v28 = vld [vmem:[#allocation2 + $0x410] sm:$0xff] }
 0x14c   :  { %1145 = vmatpush2.bf16.msra.mxu1 %v509_v27  ;;  %1179 = vmatprep.subr.bf16.mxu0 %v586_v30  ;;  %v686_v27 = vunpack.c.h.s8.bf16 %v314_v22  ;;  %v605_v30 = vunpack.c.h.s8.bf16 %v273_v28 }
 0x14d   :  { %1146 = vmatprep.subr.bf16.mxu1 %v506_v29  ;;  %v313_v29 = vld [vmem:[#allocation2 + $0x550] sm:$0xff] }
 0x14e   :  { %v685_v31 = vunpack.c.h.s8.bf16 %v313_v29 }
 0x14f   :  { %1180 = vmatpush2.bf16.msra.mxu0 %v585_v34  ;;  %v310_v34 = vld [vmem:[#allocation2 + $0x538] sm:$0xff] }
 0x150   :  { %1147 = vmatpush2.bf16.msra.mxu1 %v505_v33  ;;  %1181 = vmatprep.subr.bf16.mxu0 %v582_v1  ;;  %v302_v33 = vld [vmem:[#allocation2 + $0x4f8] sm:$0xff]  ;;  %v601_v1 = vunpack.c.l.s8.bf16 %v273_v28  ;;  %v678_v38 = vunpack.c.h.s8.bf16 %v310_v34  ;;  %v674_v9 = vunpack.c.l.s8.bf16 %v310_v34 }
 0x151   :  { %1198 = vmatprep.subr.bf16.mxu1 %v630_v36  ;;  %v681_v36 = vunpack.c.l.s8.bf16 %v313_v29  ;;  %v662_v37 = vunpack.c.h.s8.bf16 %v302_v33 }
 0x152   :  { %v863_v47 = vpop.f32.mrf.mxu0 }
 0x153   :  { %v904_v50 = vpop.f32.mrf.mxu1  ;;  %1149 = vmatmul.mubr.bf16.vlgmr.msra.gmra.mxu1 %v2118_v35  ;;  %v864_v51 = vadd.f32 %v863_v47, %v2153_v57  ;;  %1182 = vmatpush2.bf16.msra.mxu0 %v581_v39  ;;  %v301_v39 = vld [vmem:[#allocation2 + $0x4f0] sm:$0xff]  ;;  %v306_v47 = vld [vmem:[#allocation2 + $0x518] sm:$0xff] }
 0x154   :  { %1199 = vmatpush1.bf16.msra.mxu1 %v629_v40  ;;  %v865_v60 = vpop.f32.mrf.mxu0  ;;  %1183 = vmatprep.subr.bf16.mxu0 %v578_v42  ;;  %v661_v40 = vunpack.c.h.s8.bf16 %v301_v39 }
 0x155   :  { %v906_v43 = vpop.f32.mrf.mxu1  ;;  %1200 = vmatprep.subr.bf16.mxu1 %v626_v55  ;;  %v2162_v2 = vadd.f32 %v904_v50, %v864_v51  ;;  %v866_v5 = vadd.f32 %v865_v60, %v2155_v54  ;;  %1230 = vmatprep.mubr.bf16.mxu1 %v2124_v3  ;;  %v569_v54 = vunpack.c.l.s8.bf16 %v257_v62  ;;  %v617_v3 = vunpack.c.l.s8.bf16 %v281_v63  ;;  %v297_v60 = vld [vmem:[#allocation2 + $0x4d0] sm:$0xff] }
 0x156   :  { %v867_v35 = vpop.f32.mrf.mxu0  ;;  %v658_v55 = vunpack.c.l.s8.bf16 %v302_v33  ;;  %v657_v50 = vunpack.c.l.s8.bf16 %v301_v39  ;;  %v650_v62 = vunpack.c.l.s8.bf16 %v298_v45  ;;  %v666_v63 = vunpack.c.l.s8.bf16 %v306_v47 }
 0x157   :  { %v908_v57 = vpop.f32.mrf.mxu1  ;;  %v2166_v0 = vadd.f32 %v906_v43, %v866_v5  ;;  %1184 = vmatpush2.bf16.msra.mxu0 %v577_v56  ;;  %v654_v56 = vunpack.c.h.s8.bf16 %v298_v45  ;;  %v305_v43 = vld [vmem:[#allocation2 + $0x510] sm:$0xff]  ;;  %v294_v5 = vld [vmem:[#allocation2 + $0x4b8] sm:$0xff] }
 0x158   :  { %1201 = vmatpush1.bf16.msra.mxu1 %v625_v59  ;;  %v868_v41 = vpop.f32.mrf.mxu0  ;;  %1185 = vmatprep.subr.bf16.mxu0 %v574_v61  ;;  %v670_v59 = vunpack.c.h.s8.bf16 %v306_v47  ;;  %v653_v61 = vunpack.c.h.s8.bf16 %v297_v60  ;;  %v334_v35 = vld [vmem:[#allocation2 + $0x5f8] sm:$0xff]  ;;  %v649_v57 = vunpack.c.l.s8.bf16 %v297_v60  ;;  %v642_v53 = vunpack.c.l.s8.bf16 %v294_v5  ;;  %v321_v47 = vld [vmem:[#allocation2 + $0x590] sm:$0xff] }
 0x159   :  { %v909_v46 = vpop.f32.mrf.mxu1  ;;  %1202 = vmatprep.subr.bf16.mxu1 %v622_v44  ;;  %v669_v44 = vunpack.c.h.s8.bf16 %v305_v43  ;;  %v726_v41 = vunpack.c.h.s8.bf16 %v334_v35 }
 0x15a   :  { %v293_v46 = vld [vmem:[#allocation2 + $0x4b0] sm:$0xff] }
 0x15b   :  { %1186 = vmatpush2.bf16.msra.mxu0 %v573_v6  ;;  %v665_v6 = vunpack.c.l.s8.bf16 %v305_v43 }
 0x15c   :  { %1203 = vmatpush1.bf16.msra.mxu1 %v621_v7  ;;  %1187 = vmatprep.subr.bf16.mxu0 %v570_v10  ;;  %v646_v7 = vunpack.c.h.s8.bf16 %v294_v5  ;;  %v333_v10 = vld [vmem:[#allocation2 + $0x5f0] sm:$0xff] }
 0x15d   :  { %1204 = vmatprep.subr.bf16.mxu1 %v618_v11  ;;  %v645_v11 = vunpack.c.h.s8.bf16 %v293_v46  ;;  %v725_v12 = vunpack.c.h.s8.bf16 %v333_v10  ;;  %v721_v8 = vunpack.c.l.s8.bf16 %v333_v10  ;;  %v1895_v10 = vld [vmem:[%s2322_s5 + $0x30] sm:$0xff]  }
 0x15f   :  { %1188 = vmatpush2.bf16.msra.mxu0 %v569_v54  ;;  %v722_v54 = vunpack.c.l.s8.bf16 %v334_v35  ;;  %v1893_v35 = vld [vmem:[%s2322_s5 + $0x38] sm:$0xff]  }
 0x160   :  { %1205 = vmatpush1.bf16.msra.mxu1 %v617_v3  ;;  %1239 = vmatprep.subr.bf16.mxu0 %v694_v14  ;;  %v290_v3 = vld [vmem:[#allocation2 + $0x498] sm:$0xff]  ;;  %v641_v14 = vunpack.c.l.s8.bf16 %v293_v46 }
 0x161   :  { %1206 = vmatprep.subr.bf16.mxu1 %v614_v13  ;;  %v330_v13 = vld [vmem:[#allocation2 + $0x5d8] sm:$0xff]  ;;  %v638_v15 = vunpack.c.h.s8.bf16 %v290_v3 }
 0x162   :  { %1190 = vmatmul.mubr.bf16.vlgmr.msra.gmra.mxu0 %v2122_v58  ;;  %v682_v58 = vunpack.c.l.s8.bf16 %v314_v22  ;;  %v634_v22 = vunpack.c.l.s8.bf16 %v290_v3 }
 0x163   :  { %1240 = vmatpush1.bf16.msra.mxu0 %v693_v18  ;;  %1271 = vmatprep.mubr.bf16.mxu0 %v2126_v4  ;;  %v309_v4 = vld [vmem:[#allocation2 + $0x530] sm:$0xff] }
 0x164   :  { %1207 = vmatpush1.bf16.msra.mxu1 %v613_v17  ;;  %1241 = vmatprep.subr.bf16.mxu0 %v690_v20  ;;  %v677_v42 = vunpack.c.h.s8.bf16 %v309_v4  ;;  %v673_v51 = vunpack.c.l.s8.bf16 %v309_v4  ;;  %v718_v17 = vunpack.c.h.s8.bf16 %v330_v13  ;;  %v289_v18 = vld [vmem:[#allocation2 + $0x490] sm:$0xff] }
 0x165   :  { %1208 = vmatprep.subr.bf16.mxu1 %v610_v19  ;;  %v329_v19 = vld [vmem:[#allocation2 + $0x5d0] sm:$0xff]  ;;  %v637_v20 = vunpack.c.h.s8.bf16 %v289_v18 }
 0x166   :  { %v717_v21 = vunpack.c.h.s8.bf16 %v329_v19  ;;  %v713_v28 = vunpack.c.l.s8.bf16 %v329_v19 }
 0x167   :  { %1242 = vmatpush1.bf16.msra.mxu0 %v689_v24  ;;  %v326_v24 = vld [vmem:[#allocation2 + $0x5b8] sm:$0xff] }
 0x168   :  { %1209 = vmatpush1.bf16.msra.mxu1 %v609_v23  ;;  %1243 = vmatprep.subr.bf16.mxu0 %v686_v27  ;;  %v714_v23 = vunpack.c.l.s8.bf16 %v330_v13  ;;  %v633_v27 = vunpack.c.l.s8.bf16 %v289_v18  ;;  %v710_v29 = vunpack.c.h.s8.bf16 %v326_v24  ;;  %v706_v34 = vunpack.c.l.s8.bf16 %v326_v24  ;;  %v1897_v13 = vld [vmem:[%s2322_s5 + $0x28] sm:$0xff]   ;;  %v1899_v18 = vld [vmem:[%s2322_s5 + $0x20] sm:$0xff]  }
 0x169   :  { %1210 = vmatprep.subr.bf16.mxu1 %v606_v25  ;;  %v342_v25 = vld [vmem:[#allocation2 + $0x638] sm:$0xff] }
 0x16b   :  { %1244 = vmatpush1.bf16.msra.mxu0 %v685_v31  ;;  %v325_v31 = vld [vmem:[#allocation2 + $0x5b0] sm:$0xff] }
 0x16c   :  { %1211 = vmatpush1.bf16.msra.mxu1 %v605_v30  ;;  %1245 = vmatprep.subr.bf16.mxu0 %v682_v58  ;;  %v742_v30 = vunpack.c.h.s8.bf16 %v342_v25  ;;  %v709_v58 = vunpack.c.h.s8.bf16 %v325_v31  ;;  %v705_v4 = vunpack.c.l.s8.bf16 %v325_v31  ;;  %v1904_v31 = vld [vmem:[%s2322_s5 + $0x48] sm:$0xff]  }
 0x16d   :  { %1212 = vmatprep.subr.bf16.mxu1 %v602_v32  ;;  %v341_v32 = vld [vmem:[#allocation2 + $0x630] sm:$0xff] }
 0x16e   :  { %v741_v33 = vunpack.c.h.s8.bf16 %v341_v32 }
 0x16f   :  { %1246 = vmatpush1.bf16.msra.mxu0 %v681_v36  ;;  %v322_v36 = vld [vmem:[#allocation2 + $0x598] sm:$0xff] }
 0x170   :  { %1213 = vmatpush1.bf16.msra.mxu1 %v601_v1  ;;  %1247 = vmatprep.subr.bf16.mxu0 %v678_v38  ;;  %v738_v1 = vunpack.c.l.s8.bf16 %v342_v25 }
 0x171   :  { %1214 = vmatprep.subr.bf16.mxu1 %v662_v37  ;;  %v338_v37 = vld [vmem:[#allocation2 + $0x618] sm:$0xff] }
 0x172   :  { %v734_v45 = vunpack.c.h.s8.bf16 %v338_v37 }
 0x173   :  { %1248 = vmatpush1.bf16.msra.mxu0 %v677_v42 }
 0x174   :  { %1215 = vmatpush2.bf16.msra.mxu1 %v661_v40  ;;  %1249 = vmatprep.subr.bf16.mxu0 %v674_v9  ;;  %v737_v40 = vunpack.c.l.s8.bf16 %v341_v32  ;;  %v702_v9 = vunpack.c.h.s8.bf16 %v322_v36  ;;  %v1905_v32 = vld [vmem:[%s2322_s5 + $0x8] sm:$0xff]  }
 0x175   :  { %1216 = vmatprep.subr.bf16.mxu1 %v658_v55 }
 0x177   :  { %1250 = vmatpush1.bf16.msra.mxu0 %v673_v51 }
 0x178   :  { %1217 = vmatpush2.bf16.msra.mxu1 %v657_v50  ;;  %1251 = vmatprep.subr.bf16.mxu0 %v670_v59  ;;  %v337_v50 = vld [vmem:[#allocation2 + $0x610] sm:$0xff]  ;;  %v701_v59 = vunpack.c.h.s8.bf16 %v321_v47 }
 0x179   :  { %1218 = vmatprep.subr.bf16.mxu1 %v654_v56 }
 0x17b   :  { %1252 = vmatpush1.bf16.msra.mxu0 %v669_v44  ;;  %v730_v44 = vunpack.c.l.s8.bf16 %v338_v37  ;;  %v1908_v37 = vld [vmem:[%s2322_s5 + $0xf8] sm:$0xff]  }
 0x17c   :  { %1219 = vmatpush2.bf16.msra.mxu1 %v653_v61  ;;  %1253 = vmatprep.subr.bf16.mxu0 %v666_v63  ;;  %v698_v61 = vunpack.c.l.s8.bf16 %v322_v36  ;;  %v729_v63 = vunpack.c.l.s8.bf16 %v337_v50 }
 0x17d   :  { %1220 = vmatprep.subr.bf16.mxu1 %v650_v62  ;;  %v697_v62 = vunpack.c.l.s8.bf16 %v321_v47  ;;  %v1913_v47 = vld [vmem:[%s2322_s5 + $0xa8] sm:$0xff]  }
 0x17f   :  { %1254 = vmatpush1.bf16.msra.mxu0 %v665_v6  ;;  %v1894_v6 = vld [vmem:[%s2322_s5 + $0x70] sm:$0xff]  }
 0x180   :  { %1221 = vmatpush2.bf16.msra.mxu1 %v649_v57  ;;  %1255 = vmatprep.subr.bf16.mxu0 %v726_v41  ;;  %v1329_v57 = vsub.s32 1, %v2050_v26  ;;  %v2190_v41 = vld [vmem:[%s2320_s3] sm:$0xf] }
 0x181   :  { %1222 = vmatprep.subr.bf16.mxu1 %v646_v7 }
 0x182   :  { %v1330_v46 = vrot.slane %v2190_v41, %v1329_v57 }
 0x183   :  { %1256 = vmatpush2.bf16.msra.mxu0 %v725_v12 }
 0x184   :  { %1223 = vmatpush2.bf16.msra.mxu1 %v645_v11  ;;  %1257 = vmatprep.subr.bf16.mxu0 %v722_v54  ;;  %v2202_v11 = vld [vmem:[%s2321_s4] sm:$0xf] }
 0x185   :  { %1224 = vmatprep.subr.bf16.mxu1 %v642_v53  ;;  %v1356_v53 = vrot.slane %v2202_v11, %v1329_v57  ;;  %v1922_v57 = vld [vmem:[%s2322_s5 + $0xc0] sm:$0xff]  }
 0x187   :  { %1258 = vmatpush2.bf16.msra.mxu0 %v721_v8  ;;  %v1898_v8 = vld [vmem:[%s2322_s5 + $0x60] sm:$0xff]  }
 0x188   :  { %1225 = vmatpush2.bf16.msra.mxu1 %v641_v14  ;;  %1259 = vmatprep.subr.bf16.mxu0 %v718_v17 }
 0x189   :  { %1226 = vmatprep.subr.bf16.mxu1 %v638_v15 }
 0x18b   :  { %1260 = vmatpush2.bf16.msra.mxu0 %v717_v21  ;;  %v1900_v21 = vld [vmem:[%s2322_s5 + $0x58] sm:$0xff]  }
 0x18c   :  { %1227 = vmatpush2.bf16.msra.mxu1 %v637_v20  ;;  %1261 = vmatprep.subr.bf16.mxu0 %v714_v23  ;;  %v1325_v20 = vsub.s32 0, %v2050_v26 }
 0x18d   :  { %1228 = vmatprep.subr.bf16.mxu1 %v634_v22 }
 0x18e   :  { %v1326_v25 = vrot.slane %v2190_v41, %v1325_v20 }
 0x18f   :  { %1262 = vmatpush2.bf16.msra.mxu0 %v713_v28  ;;  %v1903_v28 = vld [vmem:[%s2322_s5 + $0x10] sm:$0xff]  }
 0x190   :  { %1229 = vmatpush2.bf16.msra.mxu1 %v633_v27  ;;  %1263 = vmatprep.subr.bf16.mxu0 %v710_v29  ;;  %v1902_v27 = vld [vmem:[%s2322_s5 + $0x50] sm:$0xff]  }
 0x191   :  { %1288 = vmatprep.subr.bf16.mxu1 %v742_v30  ;;  %v1352_v30 = vrot.slane %v2202_v11, %v1325_v20 }
 0x192   :  { %v2170_v38 = vpop.f32.mrf.mxu0 }
 0x193   :  { %v2172_v39 = vpop.f32.mrf.mxu1  ;;  %1231 = vmatmul.mubr.bf16.vlgmr.msra.gmra.mxu1 %v2134_v48  ;;  %1264 = vmatpush2.bf16.msra.mxu0 %v709_v58  ;;  %v733_v48 = vunpack.c.h.s8.bf16 %v337_v50  ;;  %v946_v17 = vadd.f32 %v2170_v38, %v2162_v2  ;;  %v1901_v2 = vld [vmem:[%s2322_s5 + $0x18] sm:$0xff]   ;;  %v1914_v50 = vld [vmem:[%s2322_s5 + $0xe0] sm:$0xff]  }
 0x194   :  { %1289 = vmatpush1.bf16.msra.mxu1 %v741_v33  ;;  %v947_v42 = vpop.f32.mrf.mxu0  ;;  %1265 = vmatprep.subr.bf16.mxu0 %v706_v34  ;;  %v1906_v33 = vld [vmem:[%s2322_s5 + $0x40] sm:$0xff]   ;;  %v1909_v38 = vld [vmem:[%s2322_s5 + $0xb8] sm:$0xff]  }
 0x195   :  { %v988_v55 = vpop.f32.mrf.mxu1  ;;  %1290 = vmatprep.subr.bf16.mxu1 %v738_v1  ;;  %1312 = vmatprep.mubr.bf16.mxu1 %v1996_v52  ;;  %v1892_v52 = vld [vmem:[%s2322_s5 + $0x78] sm:$0xff]   ;;  %v948_v5 = vadd.f32 %v947_v42, %v2166_v0  ;;  %v987_v23 = vadd.f32 %v2172_v39, %v946_v17  ;;  %v1907_v34 = vld [vmem:[%s2322_s5] sm:$0xff]   ;;  %v1911_v42 = vld [vmem:[%s2322_s5 + $0xb0] sm:$0xff]  }
 0x196   :  { %v949_v51 = vpop.f32.mrf.mxu0 }
 0x197   :  { %v990_v56 = vpop.f32.mrf.mxu1  ;;  %1266 = vmatpush2.bf16.msra.mxu0 %v705_v4  ;;  %v989_v0 = vadd.f32 %v988_v55, %v948_v5  ;;  %v1915_v51 = vld [vmem:[%s2322_s5 + $0xa0] sm:$0xff]   ;;  %v1920_v5 = vld [vmem:[%s2322_s5 + $0xc8] sm:$0xff]  }
 0x198   :  { %1291 = vmatpush1.bf16.msra.mxu1 %v737_v40  ;;  %v950_v60 = vpop.f32.mrf.mxu0  ;;  %1267 = vmatprep.subr.bf16.mxu0 %v702_v9  ;;  %v1910_v40 = vld [vmem:[%s2322_s5 + $0xf0] sm:$0xff]   ;;  %v1916_v56 = vld [vmem:[%s2322_s5 + $0xd8] sm:$0xff]  }
 0x199   :  { %v991_v43 = vpop.f32.mrf.mxu1  ;;  %1292 = vmatprep.subr.bf16.mxu1 %v734_v45  ;;  %v1912_v45 = vld [vmem:[%s2322_s5 + $0xe8] sm:$0xff]  }
 0x19b   :  { %1268 = vmatpush2.bf16.msra.mxu0 %v701_v59  ;;  %v1917_v59 = vld [vmem:[%s2322_s5 + $0x98] sm:$0xff]  }
 0x19c   :  { %1293 = vmatpush1.bf16.msra.mxu1 %v733_v48  ;;  %1269 = vmatprep.subr.bf16.mxu0 %v698_v61  ;;  %v1918_v61 = vld [vmem:[%s2322_s5 + $0xd0] sm:$0xff]  }
 0x19d   :  { %1294 = vmatprep.subr.bf16.mxu1 %v730_v44 }
 0x19f   :  { %1270 = vmatpush2.bf16.msra.mxu0 %v697_v62  ;;  %v1919_v62 = vld [vmem:[%s2322_s5 + $0x90] sm:$0xff]  }
 0x1a0   :  { %1295 = vmatpush1.bf16.msra.mxu1 %v729_v63  ;;  %1833 = vmatprep.subr.bf16.mxu0 %v1892_v52 }
 0x1a1   :  { %1855 = vmatprep.subr.bf16.mxu1 %v1908_v37 }
 0x1a2   :  { %v1027_v7 = vpop.f32.mrf.mxu0  ;;  %1272 = vmatmul.mubr.bf16.vlgmr.msra.gmra.mxu0 %v2138_v49  ;;  %v1896_v49 = vld [vmem:[%s2322_s5 + $0x68] sm:$0xff]  }
 0x1a3   :  { %1798 = vmatmul.mubr.msk.bf16.vlgmr.msra.gmra.mxu1 %vm743_vm0, %v2147_v16  ;;  %1834 = vmatpush3.bf16.msra.mxu0 %v1893_v35  ;;  %v1028_v24 = vadd.f32 %v1027_v7, %v987_v23  ;;  %v1921_v35 = vld [vmem:[%s2322_s5 + $0x88] sm:$0xff]  }
 0x1a4   :  { %v1029_v12 = vpop.f32.mrf.mxu0  ;;  %1835 = vmatprep.subr.bf16.mxu0 %v1894_v6  ;;  %1856 = vmatpush3.bf16.msra.mxu1 %v1909_v38  ;;  %v1923_v6 = vld [vmem:[%s2322_s5 + $0x80] sm:$0xff]  }
 0x1a5   :  { %v1030_v16 = vadd.f32 %v1029_v12, %v989_v0  ;;  %v1343_v29 = vmul.f32 %v1326_v25, %v1028_v24  ;;  %1857 = vmatprep.subr.bf16.mxu1 %v1910_v40 }
 0x1a6   :  { %v1031_v54 = vpop.f32.mrf.mxu0 }
 0x1a7   :  { %v1344_v3 = vmul.f32 %v1330_v46, %v1030_v16  ;;  %1836 = vmatpush3.bf16.msra.mxu0 %v1895_v10  ;;  %v1369_v58 = vadd.f32 %v1352_v30, %v1343_v29 }
 0x1a8   :  { %v1032_v14 = vpop.f32.mrf.mxu0  ;;  %1837 = vmatprep.subr.bf16.mxu0 %v1896_v49  ;;  %1858 = vmatpush3.bf16.msra.mxu1 %v1911_v42 }
 0x1a9   :  { %v1370_v15 = vadd.f32 %v1356_v53, %v1344_v3  ;;  %v1373_v1 = vmax.f32 %v1369_v58, 0.0  ;;  %1859 = vmatprep.subr.bf16.mxu1 %v1912_v45 }
 0x1ab   :  { %1838 = vmatpush3.bf16.msra.mxu0 %v1897_v13  ;;  %v1374_v19 = vmax.f32 %v1370_v15, 0.0  ;;  %v1377_v36 = vpack.c.bf16 %v1373_v1, %v1373_v1 }
 0x1ac   :  { %1839 = vmatprep.subr.bf16.mxu0 %v1898_v8  ;;  %1860 = vmatpush3.bf16.msra.mxu1 %v1913_v47 }
 0x1ad   :  { %v1378_v22 = vpack.c.bf16 %v1374_v19, %v1374_v19  ;;  %1861 = vmatprep.subr.bf16.mxu1 %v1914_v50 }
 0x1af   :  { %1840 = vmatpush3.bf16.msra.mxu0 %v1899_v18  ;;  %1676 = vmatprep.mubr.bf16.mxu0 %v1378_v22  ;;  %v1333_v18 = vsub.s32 2, %v2050_v26 }
 0x1b0   :  { %1841 = vmatprep.subr.bf16.mxu0 %v1900_v21  ;;  %1862 = vmatpush3.bf16.msra.mxu1 %v1915_v51  ;;  %v1337_v21 = vsub.s32 3, %v2050_v26 }
 0x1b1   :  { %1863 = vmatprep.subr.bf16.mxu1 %v1916_v56  ;;  %v1334_v25 = vrot.slane %v2190_v41, %v1333_v18  ;;  %v1360_v30 = vrot.slane %v2202_v11, %v1333_v18 }
 0x1b2   :  { %v1364_v26 = vrot.slane %v2202_v11, %v1337_v21  ;;  %v1799_v11 = vld [vmem:[%s2323_s6] ss:$0 sm:$0xff] }
 0x1b3   :  { %1842 = vmatpush3.bf16.msra.mxu0 %v1901_v2 }
 0x1b4   :  { %1843 = vmatprep.subr.bf16.mxu0 %v1902_v27  ;;  %1864 = vmatpush3.bf16.msra.mxu1 %v1917_v59 }
 0x1b5   :  { %1865 = vmatprep.subr.bf16.mxu1 %v1918_v61 }
 0x1b7   :  { %1844 = vmatpush3.bf16.msra.mxu0 %v1903_v28 }
 0x1b8   :  { %1845 = vmatprep.subr.bf16.mxu0 %v1904_v31  ;;  %1866 = vmatpush3.bf16.msra.mxu1 %v1919_v62 }
 0x1b9   :  { %1867 = vmatprep.subr.bf16.mxu1 %v1920_v5 }
 0x1bb   :  { %1846 = vmatpush3.bf16.msra.mxu0 %v1905_v32  ;;  %v1338_v32 = vrot.slane %v2190_v41, %v1337_v21 }
 0x1bc   :  { %1847 = vmatprep.subr.bf16.mxu0 %v1906_v33  ;;  %1868 = vmatpush3.bf16.msra.mxu1 %v1921_v35 }
 0x1bd   :  { %1869 = vmatprep.subr.bf16.mxu1 %v1922_v57 }
 0x1bf   :  { %1848 = vmatpush3.bf16.msra.mxu0 %v1907_v34 }
 0x1c0   :  { %1870 = vmatpush3.bf16.msra.mxu1 %v1923_v6 }
 0x1c2   :  { %1677 = vmatmul.mubr.bf16.vlgmr.msra.gmra.mxu0 %v1377_v36 }
 0x1d3   :  { %v1068_v39 = vpop.f32.mrf.mxu1 }
 0x1d5   :  { %v1070_v4 = vpop.f32.mrf.mxu1 }
 0x1d7   :  { %v1072_v55 = vpop.f32.mrf.mxu1 }
 0x1d9   :  { %v1073_v9 = vpop.f32.mrf.mxu1 }
 0x1e2   :  { %v1109_v48 = vpop.f32.mrf.mxu0 }
 0x1e3   :  { %v1110_v60 = vadd.f32 %v1109_v48, %v1068_v39 }
 0x1e4   :  { %v1111_v43 = vpop.f32.mrf.mxu0 }
 0x1e5   :  { %v1112_v44 = vadd.f32 %v1111_v43, %v1070_v4 }
 0x1e6   :  { %v1113_v63 = vpop.f32.mrf.mxu0 }
 0x1e8   :  { %v1114_v52 = vpop.f32.mrf.mxu0 }
 0x213   :  { %v1150_v7 = vpop.f32.mrf.mxu1 }
 0x214   :  { %v1151_v0 = vadd.f32 %v1150_v7, %v1110_v60 }
 0x215   :  { %v1152_v46 = vpop.f32.mrf.mxu1 }
 0x216   :  { %v1153_v10 = vadd.f32 %v1152_v46, %v1112_v44 }
 0x217   :  { %v1154_v12 = vpop.f32.mrf.mxu1 }
 0x218   :  { %v1999_v12 = vmov 0.0  }
 0x219   :  { %v1155_v49 = vpop.f32.mrf.mxu1  ;;  %50 = vst.msk [vmem:[#allocation6] sm:$0x1] %vm49_vm2, %v1999_v12 }
 0x222   :  { %v1191_v16 = vpop.f32.mrf.mxu0 }
 0x223   :  { %v1192_v17 = vadd.f32 %v1191_v16, %v1151_v0 }
 0x224   :  { %v1193_v53 = vpop.f32.mrf.mxu0 }
 0x225   :  { %v1194_v19 = vadd.f32 %v1193_v53, %v1153_v10  ;;  %v1726_v10 = vld [vmem:[%s2318_s1] sm:$0x3] }
 0x226   :  { %v1195_v54 = vpop.f32.mrf.mxu0 }
 0x228   :  { %v1196_v3 = vpop.f32.mrf.mxu0 }
 0x253   :  { %v1232_v13 = vpop.f32.mrf.mxu1 }
 0x254   :  { %v1233_v20 = vadd.f32 %v1232_v13, %v1192_v17  ;;  %v1739_v17 = vld [vmem:[#allocation6] sm:$0x1] }
 0x255   :  { %v1234_v14 = vpop.f32.mrf.mxu1 }
 0x256   :  { %v1235_v2 = vadd.f32 %v1234_v14, %v1194_v19 }
 0x257   :  { %v1236_v8 = vpop.f32.mrf.mxu1 }
 0x259   :  { %v1237_v15 = vpop.f32.mrf.mxu1 }
 0x262   :  { %v1273_v22 = vpop.f32.mrf.mxu0 }
 0x263   :  { %v1314_v23 = vpop.f32.mrf.mxu1  ;;  %v1274_v24 = vadd.f32 %v1273_v22, %v1233_v20 }
 0x264   :  { %v1275_v27 = vpop.f32.mrf.mxu0 }
 0x265   :  { %v1316_v28 = vpop.f32.mrf.mxu1  ;;  %v1315_v29 = vadd.f32 %v1314_v23, %v1274_v24  ;;  %v1276_v31 = vadd.f32 %v1275_v27, %v1235_v2 }
 0x266   :  { %v1277_v58 = vpop.f32.mrf.mxu0 }
 0x267   :  { %v1318_v33 = vpop.f32.mrf.mxu1  ;;  %v1345_v34 = vmul.f32 %v1334_v25, %v1315_v29  ;;  %v1317_v1 = vadd.f32 %v1316_v28, %v1276_v31 }
 0x268   :  { %v1278_v36 = vpop.f32.mrf.mxu0 }
 0x269   :  { %v1319_v37 = vpop.f32.mrf.mxu1  ;;  %v1371_v38 = vadd.f32 %v1360_v30, %v1345_v34  ;;  %v1346_v39 = vmul.f32 %v1338_v32, %v1317_v1 }
 0x26b   :  { %v1372_v4 = vadd.f32 %v1364_v26, %v1346_v39  ;;  %v1375_v40 = vmax.f32 %v1371_v38, 0.0 }
 0x26d   :  { %v1376_v42 = vmax.f32 %v1372_v4, 0.0  ;;  %v1379_v9 = vpack.c.bf16 %v1375_v40, %v1375_v40 }
 0x26f   :  { %v1380_v55 = vpack.c.bf16 %v1376_v42, %v1376_v42 }
 0x271   :  { %1716 = vmatprep.mubr.bf16.mxu1 %v1380_v55 }
 0x272   :  { %1717 = vmatmul.mubr.bf16.vlgmr.msra.gmra.mxu1 %v1379_v9 }
 0x282   :  { %v1849_v45 = vpop.f32.mrf.mxu0 }
 0x284   :  { %v1850_v47 = vpop.f32.mrf.mxu0 }
 0x285   :  { %v1851_v41 = vadd.f32 %v1850_v47, %v1849_v45 }
 0x286   :  { %v1852_v50 = vpop.f32.mrf.mxu0 }
 0x287   :  { %v1679_v48 = vadd.f32 %v1851_v41, %v1799_v11 }
 0x288   :  { %v1853_v51 = vpop.f32.mrf.mxu0 }
 0x332   :  { %v1871_v56 = vpop.f32.mrf.mxu1 }
 0x334   :  { %v1872_v59 = vpop.f32.mrf.mxu1 }
 0x335   :  { %v1873_v60 = vadd.f32 %v1872_v59, %v1871_v56 }
 0x336   :  { %v1874_v43 = vpop.f32.mrf.mxu1 }
 0x337   :  { %v1719_v61 = vadd.f32 %v1873_v60, %v1679_v48 }
 0x338   :  { %v1875_v44 = vpop.f32.mrf.mxu1 }
 0x339   :  { %v1741_v62 = vmul.f32 %v1719_v61, %v1719_v61  ;;  %v1724_v63 = vmul.f32 1.442695, %v1719_v61 }
 0x33b   :  { %1743 = vrot.lane.b32.xlu0 %v1741_v62, %s1997_s11  ;;  %1924 = vpow2.f32 %v1724_v63 }
 0x348   :  { %v1925_v52 = vpop.eup %1924 }
 0x349   :  { %v1740_v5 = vmul.f32 %v1925_v52, %v1925_v52 }
 0x3ad   :  { %v1744_v35 = vpop.permute.xlu0 %1743 }
 0x3ae   :  { %v1746_v57 = vadd.f32 %v1744_v35, %v1740_v5 }
 0x3b0   :  { %v1747_v6 = vsub.f32 %v1746_v57, %v1719_v61 }
 0x3b2   :  { %v1832_v7 = vadd.f32 -0.5, %v1747_v6 }
 0x3b4   :  { %1750 = vrot.lane.b32.xlu0 %v1832_v7, %s1998_s2 }
 0x426   :  { %v1751_v0 = vpop.permute.xlu0 %1750 }
 0x427   :  { %v1753_v46 = vsel %vm1737_vm1, %v1751_v0, 0.0 }
 0x428   :  { %1754 = vadd.xlane.f32.xlu1 %v1753_v46 }
 0x439   :  { %1728 = vrot.lane.b32.xlu1 %v1726_v10, %s1997_s11 }
 0x4b1   :  { %v1755_v49 = vpop.xlane.xlu1 %1754 }
 0x4b2   :  { %v1756_v16 = vrot.slane %v1755_v49, 4 }
 0x4b4   :  { %v1757_v53 = vadd.f32 %v1756_v16, %v1755_v49 }
 0x4b5   :  { %v1729_v54 = vpop.permute.xlu1 %1728 }
 0x4b6   :  { %v1758_v3 = vrot.slane %v1757_v53, 2  ;;  %v1731_v13 = vmul.f32 %v1925_v52, %v1729_v54 }
 0x4b8   :  { %1733 = vrot.lane.b32.xlu0 %v1731_v13, %s1998_s2  ;;  %v1759_v14 = vadd.f32 %v1758_v3, %v1757_v53 }
 0x4ba   :  { %v1760_v8 = vrot.slane %v1759_v14, 1 }
 0x4bc   :  { %v1761_v15 = vadd.f32 %v1760_v8, %v1759_v14 }
 0x4be   :  { %1877 = vpush %v1761_v15 }
 0x4ef   :  { %s1878_s1 = spop %1877 }
 0x4f0   :  { %v1763_v18 = vstv %s1878_s1 }
 0x4f1   :  { %v1764_v19 = vadd.f32 %v1763_v18, %v1739_v17 }
 0x4f3   :  { %1766 = vst.msk [vmem:[#allocation6] sm:$0x1] %vm49_vm2, %v1764_v19 }
 0x4f4   :  { %1957 = shalt.err (!%p1954_p9)
}
 0x4f5   :  { %1786 = dma.vmem_to_hbm [thread:$0]  %s1784_s14, 16, %s2325_s8, [#allocation7]  }
 0x4f6   :  { %s2001_s0 = smov [#allocation5]  }
 0x4f7   :  { %s1773_s19 = sshll.u32 %s2001_s0, 4  ;;  %s1774_s19 = int_to_ptr.vmem [resolvable:$true] %s1773_s19 }
 0x4f8   :  { %s1966_s20 = scalar_lea.vmem %s1774_s19, 32  ;;  %p1971_p11 = scmp.lt.s32.totalorder %s1774_s19, %s1774_s19 }
 0x4f9   :  { %p1967_p10 = scmp.ne.s32.totalorder %s1774_s19, %s1966_s20  ;;  %p1972_p12 = scmp.lt.s32.totalorder %s1966_s20, %s1966_s20 }
 0x4fb   :  { %p1973_p13 = por %p1972_p12, %p1971_p11 }
 0x4fd   :  { %p1974_p0 = pnand %p1973_p13, %p1967_p10 }
 0x52a   :  { %v1734_v20 = vpop.permute.xlu0 %1733 }
 0x52b   :  { %v1736_v21 = vadd.f32 %v1734_v20, %v1719_v61 }
 0x52d   :  { %1738 = vst.msk [vmem:[#allocation5] sm:$0x3] %vm1737_vm1, %v1736_v21 }
 0x52e   :  { %1977 = shalt.err (!%p1974_p0)
}
 0x52f   :  { %1776 = dma.vmem_to_hbm [thread:$0]  %s1774_s19, 32, %s2324_s7, [#allocation4]  }
 0x530   :  { %1988 = dma.done.wait [#allocation4], 32  }
 0x531   :  { %1989 = vsyncadd [#allocation4], 4294967264 }
 0x532   :  { %1990 = dma.done.wait [#allocation7], 16  }
 0x533   :  { %1991 = vsyncadd [#allocation7], 4294967280 }
 0x534   :  { %1793 = vsyncpa [#allocation3], 1 }
 0x535   :  { %1794 = vsyncpa [#allocation4], 1 }
 0x536   :  { %1795 = vsyncpa [#allocation7], 1 }

</bundles_post_ra>
